<compile_context>
chip_gen: v6e
topology: v6e:2x2x1
jax: 0.10.0
libtpu: 0.0.40
codegen_flags: <defaults>
</compile_context>

<pallas_src>
import functools
import math

import numpy as np
import jax
import jax.numpy as jnp
from jax.experimental import pallas as pl
from jax.experimental.pallas import tpu as pltpu

_EPS = 1e-5


def _double_conv_kernel(x0_ref, x1_ref, x2_ref, w1_ref, p1_ref, g1_ref, b1_ref,
                        w2_ref, p2_ref, g2_ref, b2_ref, o_ref, sh_ref,
                        *, n_img, height, width):
    # Lane-dense layout: lane = x*C + c.
    #   x0/x1/x2 : (N*H, W*Cin)   pre-shifted (per ky) H-padded input slabs
    #   w1_ref   : (3, W*Cin, W*Cm)  banded conv1 weights (x padding folded in)
    #   p1_ref   : (W*Cm, W*Cm)      0/1 channel-pooling matrix (sums lanes of equal c)
    #   g1/b1    : (1, W*Cm)         BN1 gamma/beta pre-tiled across x
    #   w2_ref   : (3, W*Cm, W*Cout) banded conv2 weights
    #   p2_ref   : (W*Cout, W*Cout)
    #   g2/b2    : (1, W*Cout)
    #   o_ref    : (N*H, W*Cout)     lane-dense output (one full-lane store)
    #   sh_ref   : (2, N*H, W*Cm)    scratch: row-shifted conv2 LHS slabs (ky=0, ky=2)
    H = height
    WCm = w1_ref.shape[2]
    inv_m = 1.0 / float(n_img * H * width)

    # ---- conv1: batched-M matmuls (M = N*H), one per ky; ky=0 dot initializes ----
    z1 = jnp.dot(x0_ref[...], w1_ref[0], preferred_element_type=jnp.float32)
    z1 = z1 + jnp.dot(x1_ref[...], w1_ref[1], preferred_element_type=jnp.float32)
    z1 = z1 + jnp.dot(x2_ref[...], w1_ref[2], preferred_element_type=jnp.float32)

    # ---- BatchNorm1 (training mode, biased variance), two-pass for stability ------
    s1 = jnp.sum(z1, axis=0, keepdims=True)
    mean1 = jnp.dot(s1, p1_ref[...], preferred_element_type=jnp.float32) * inv_m
    d1 = z1 - mean1
    q1 = jnp.sum(d1 * d1, axis=0, keepdims=True)
    var1 = jnp.dot(q1, p1_ref[...], preferred_element_type=jnp.float32) * inv_m
    scale1 = g1_ref[...] * jax.lax.rsqrt(var1 + _EPS)
    a1 = jnp.maximum(d1 * scale1 + b1_ref[...], 0.0)          # (N*H, W*Cm)

    # ---- assemble the two row-shifted conv2 LHS slabs (halo rows zeroed) ----------
    zero_row = jnp.zeros((1, WCm), jnp.float32)
    for n in range(n_img):                                      # data movement only
        r0 = n * H
        # ky = 0 tap reads a1 row (y-1): shift down inside each image, zero top row.
        sh_ref[0, r0:r0 + 1, :] = zero_row
        sh_ref[0, r0 + 1:r0 + H, :] = a1[r0:r0 + H - 1, :]
        # ky = 2 tap reads a1 row (y+1): shift up inside each image, zero bottom row.
        sh_ref[1, r0:r0 + H - 1, :] = a1[r0 + 1:r0 + H, :]
        sh_ref[1, r0 + H - 1:r0 + H, :] = zero_row

    # ---- conv2: batched-M matmuls (center tap straight from registers) ------------
    z2 = jnp.dot(a1, w2_ref[1], preferred_element_type=jnp.float32)
    z2 = z2 + jnp.dot(sh_ref[0], w2_ref[0], preferred_element_type=jnp.float32)
    z2 = z2 + jnp.dot(sh_ref[1], w2_ref[2], preferred_element_type=jnp.float32)

    # ---- BatchNorm2 + ReLU; single full-lane output store --------------------------
    s2 = jnp.sum(z2, axis=0, keepdims=True)
    mean2 = jnp.dot(s2, p2_ref[...], preferred_element_type=jnp.float32) * inv_m
    d2 = z2 - mean2
    q2 = jnp.sum(d2 * d2, axis=0, keepdims=True)
    var2 = jnp.dot(q2, p2_ref[...], preferred_element_type=jnp.float32) * inv_m
    scale2 = g2_ref[...] * jax.lax.rsqrt(var2 + _EPS)
    o_ref[...] = jnp.maximum(d2 * scale2 + b2_ref[...], 0.0).astype(o_ref.dtype)


def _banded_weights(w, width):
    """w: (Cout, Cin, 3, 3) OIHW conv weight.
    Returns (3, width*Cin, width*Cout): per ky, a banded matrix B such that a 'same'
    3x3 conv of one output row is  out_row(y) = sum_ky in_row(y+ky-1) @ B[ky]
    with in/out rows in lane-dense (x*C + c) layout and the x zero-padding folded
    into the band (out-of-range taps are simply absent)."""
    cout, cin = int(w.shape[0]), int(w.shape[1])
    wk = jnp.transpose(w, (2, 3, 1, 0)).astype(jnp.float32)       # (ky, kx, Cin, Cout)
    sel = np.zeros((3, width, width), np.float32)                 # (kx, x_out, x_in)
    for dx in range(3):
        for x in range(width):
            xin = x + dx - 1
            if 0 <= xin < width:
                sel[dx, x, xin] = 1.0
    band = jnp.einsum('dxj,edio->ejixo', jnp.asarray(sel), wk)    # (3, W, Cin, W, Cout)
    return band.reshape(3, width * cin, width * cout)


def _channel_pool_matrix(width, c):
    """(W*C, W*C) 0/1 matrix P with (v @ P)[x*C + ch] = sum_x' v[x'*C + ch]."""
    return jnp.asarray(np.tile(np.eye(c, dtype=np.float32), (width, width)))


def _maybe_pad_channels(c, width):
    """Smallest c' >= c with width*c' % 128 == 0, if it costs at most 2x; else c."""
    step = 128 // math.gcd(width, 128)
    cp = ((c + step - 1) // step) * step
    return cp if cp <= max(2 * c, 8) else c


def double_conv(x_nchw, params):
    """params = (w1 (Cm,Cin,3,3), g1 (Cm,), b1 (Cm,), w2 (Cout,Cm,3,3), g2, b2).
    Training-mode BatchNorm (batch statistics, biased variance), matching a freshly
    constructed PyTorch DoubleConv in default train() mode."""
    w1, g1, b1, w2, g2, b2 = params
    x = jnp.transpose(x_nchw, (0, 2, 3, 1)).astype(jnp.float32)   # NCHW -> NHWC
    N, H, W, Cin = x.shape
    Cm, Cout = int(w1.shape[0]), int(w2.shape[0])

    # Pad Cin with zero channels so the conv1 LHS lane width (W*Cin) is a full
    # multiple of 128 (better MXU K fill, unmasked lane tiles).
    cin_p = _maybe_pad_channels(Cin, W)
    w1p = w1
    if cin_p != Cin:
        x = jnp.pad(x, ((0, 0), (0, 0), (0, 0), (0, cin_p - Cin)))
        w1p = jnp.pad(w1, ((0, 0), (0, cin_p - Cin), (0, 0), (0, 0)))

    # Lane-dense, H-zero-padded input (x padding is folded into the banded weights),
    # then three pre-shifted batched-M LHS slabs (one per ky). Wrapper-side plumbing.
    xp = jnp.pad(x, ((0, 0), (1, 1), (0, 0), (0, 0))).reshape(N, H + 2, W * cin_p)
    xk = [xp[:, ky:ky + H, :].reshape(N * H, W * cin_p) for ky in range(3)]

    w1b = _banded_weights(w1p, W)                                  # (3, W*Cin_p, W*Cm)
    w2b = _banded_weights(w2, W)                                   # (3, W*Cm, W*Cout)
    p1 = _channel_pool_matrix(W, Cm)
    p2 = _channel_pool_matrix(W, Cout)
    g1d = jnp.tile(g1.astype(jnp.float32), W).reshape(1, W * Cm)
    b1d = jnp.tile(b1.astype(jnp.float32), W).reshape(1, W * Cm)
    g2d = jnp.tile(g2.astype(jnp.float32), W).reshape(1, W * Cout)
    b2d = jnp.tile(b2.astype(jnp.float32), W).reshape(1, W * Cout)

    def spec(shape):
        nd = len(shape)
        return pl.BlockSpec(shape, lambda i, nd=nd: (0,) * nd)

    kernel = functools.partial(_double_conv_kernel, n_img=N, height=H, width=W)

    y = pl.pallas_call(
        kernel,
        out_shape=jax.ShapeDtypeStruct((N * H, W * Cout), jnp.float32),
        grid_spec=pltpu.PrefetchScalarGridSpec(
            num_scalar_prefetch=0,
            # grid=(1,): BN batch statistics couple all images, so this small problem
            # is one fused step (see TODO at top for the production-size band grid).
            grid=(1,),
            in_specs=[spec(xk[0].shape), spec(xk[1].shape), spec(xk[2].shape),
                      spec(w1b.shape), spec(p1.shape),
                      spec(g1d.shape), spec(b1d.shape),
                      spec(w2b.shape), spec(p2.shape),
                      spec(g2d.shape), spec(b2d.shape)],
            out_specs=spec((N * H, W * Cout)),
            scratch_shapes=[
                pltpu.VMEM((2, N * H, W * Cm), jnp.float32),  # shifted conv2 LHS slabs
            ],
        ),
        # Toy sizes fit the default scoped VMEM; set vmem_limit_bytes explicitly once
        # tiles are enlarged (v7x budget is 64 MiB physical / 32 MiB scoped default).
        compiler_params=pltpu.CompilerParams(dimension_semantics=("arbitrary",)),
    )(xk[0], xk[1], xk[2], w1b, p1, g1d, b1d, w2b, p2, g2d, b2d)

    y = y.reshape(N, H, W, Cout)
    return jnp.transpose(y, (0, 3, 1, 2))                          # NHWC -> NCHW


def ref_double_conv(x_nchw, params):
    """Pure-JAX reference (NCHW), training-mode BN (biased variance)."""
    w1, g1, b1, w2, g2, b2 = params

    def conv(x, w):
        return jax.lax.conv_general_dilated(
            x, w, window_strides=(1, 1), padding=((1, 1), (1, 1)),
            dimension_numbers=("NCHW", "OIHW", "NCHW"))

    def bn_relu(z, g, b):
        mean = jnp.mean(z, axis=(0, 2, 3), keepdims=True)
        var = jnp.mean((z - mean) ** 2, axis=(0, 2, 3), keepdims=True)
        zh = (z - mean) / jnp.sqrt(var + _EPS)
        return jnp.maximum(zh * g.reshape(1, -1, 1, 1) + b.reshape(1, -1, 1, 1), 0.0)

    a1 = bn_relu(conv(x_nchw, w1), g1, b1)
    return bn_relu(conv(a1, w2), g2, b2)


if __name__ == "__main__":
    key = jax.random.PRNGKey(0)
    ks = jax.random.split(key, 7)

    N, Cin, H, W = 2, 4, 16, 16
    Cm, Cout = 8, 8  # mid_channels defaults to out_channels

    x = jax.random.normal(ks[0], (N, Cin, H, W), jnp.float32)
    w1 = 0.1 * jax.random.normal(ks[1], (Cm, Cin, 3, 3), jnp.float32)
    g1 = 1.0 + 0.1 * jax.random.normal(ks[2], (Cm,), jnp.float32)
    b1 = 0.1 * jax.random.normal(ks[3], (Cm,), jnp.float32)
    w2 = 0.1 * jax.random.normal(ks[4], (Cout, Cm, 3, 3), jnp.float32)
    g2 = 1.0 + 0.1 * jax.random.normal(ks[5], (Cout,), jnp.float32)
    b2 = 0.1 * jax.random.normal(ks[6], (Cout,), jnp.float32)
    params = (w1, g1, b1, w2, g2, b2)

    y = double_conv(x, params)
    jax.block_until_ready(y)

    y_ref = ref_double_conv(x, params)
    assert y.shape == (N, Cout, H, W)
    assert jnp.allclose(y, y_ref, atol=1e-3, rtol=1e-3), "mismatch vs JAX reference"
    print("KERNEL_OK")
</pallas_src>

<mosaic_0001>
module attributes {stable_mosaic.version = 11 : i64} {
  func.func @_double_conv_kernel(%arg0: i32, %arg1: memref<32x128xf32, #tpu.memory_space<vmem>>, %arg2: memref<32x128xf32, #tpu.memory_space<vmem>>, %arg3: memref<32x128xf32, #tpu.memory_space<vmem>>, %arg4: memref<3x128x128xf32, #tpu.memory_space<vmem>>, %arg5: memref<128x128xf32, #tpu.memory_space<vmem>>, %arg6: memref<1x128xf32, #tpu.memory_space<vmem>>, %arg7: memref<1x128xf32, #tpu.memory_space<vmem>>, %arg8: memref<3x128x128xf32, #tpu.memory_space<vmem>>, %arg9: memref<128x128xf32, #tpu.memory_space<vmem>>, %arg10: memref<1x128xf32, #tpu.memory_space<vmem>>, %arg11: memref<1x128xf32, #tpu.memory_space<vmem>>, %arg12: memref<32x128xf32, #tpu.memory_space<vmem>>, %arg13: memref<2x32x128xf32, #tpu.memory_space<vmem>>) attributes {dimension_semantics = [#tpu.dimension_semantics<arbitrary>], iteration_bounds = array<i64: 1>, scalar_prefetch = 0 : i64, scratch_operands = 1 : i64, tpu.core_type = #tpu.core_type<tc>, window_params = [{pipeline_mode = #tpu.pipeline_mode<synchronous>, transform_indices = @transform_0, window_bounds = array<i64: 32, 128>}, {pipeline_mode = #tpu.pipeline_mode<synchronous>, transform_indices = @transform_1, window_bounds = array<i64: 32, 128>}, {pipeline_mode = #tpu.pipeline_mode<synchronous>, transform_indices = @transform_2, window_bounds = array<i64: 32, 128>}, {pipeline_mode = #tpu.pipeline_mode<synchronous>, transform_indices = @transform_3, window_bounds = array<i64: 3, 128, 128>}, {pipeline_mode = #tpu.pipeline_mode<synchronous>, transform_indices = @transform_4, window_bounds = array<i64: 128, 128>}, {pipeline_mode = #tpu.pipeline_mode<synchronous>, transform_indices = @transform_5, window_bounds = array<i64: 1, 128>}, {pipeline_mode = #tpu.pipeline_mode<synchronous>, transform_indices = @transform_6, window_bounds = array<i64: 1, 128>}, {pipeline_mode = #tpu.pipeline_mode<synchronous>, transform_indices = @transform_7, window_bounds = array<i64: 3, 128, 128>}, {pipeline_mode = #tpu.pipeline_mode<synchronous>, transform_indices = @transform_8, window_bounds = array<i64: 128, 128>}, {pipeline_mode = #tpu.pipeline_mode<synchronous>, transform_indices = @transform_9, window_bounds = array<i64: 1, 128>}, {pipeline_mode = #tpu.pipeline_mode<synchronous>, transform_indices = @transform_10, window_bounds = array<i64: 1, 128>}, {pipeline_mode = #tpu.pipeline_mode<synchronous>, transform_indices = @transform_11, window_bounds = array<i64: 32, 128>}]} {
    %c0 = arith.constant 0 : index
    %c0_0 = arith.constant 0 : index
    %0 = vector.load %arg1[%c0, %c0_0] : memref<32x128xf32, #tpu.memory_space<vmem>>, vector<32x128xf32>
    %c0_1 = arith.constant 0 : index
    %c0_2 = arith.constant 0 : index
    %c0_3 = arith.constant 0 : index
    %1 = vector.load %arg4[%c0_1, %c0_2, %c0_3] : memref<3x128x128xf32, #tpu.memory_space<vmem>>, vector<1x128x128xf32>
    %2 = vector.shape_cast %1 : vector<1x128x128xf32> to vector<128x128xf32>
    %cst = arith.constant dense<0.000000e+00> : vector<32x128xf32>
    %3 = tpu.matmul %0, %2, %cst {dimension_numbers = #tpu.dot_dimension_numbers<[1], [0], [0], [1], [0, 0, 1, 1], [], []>} : vector<32x128xf32>, vector<128x128xf32>, vector<32x128xf32> -> vector<32x128xf32>
    %c0_4 = arith.constant 0 : index
    %c0_5 = arith.constant 0 : index
    %4 = vector.load %arg2[%c0_4, %c0_5] : memref<32x128xf32, #tpu.memory_space<vmem>>, vector<32x128xf32>
    %c1 = arith.constant 1 : index
    %c0_6 = arith.constant 0 : index
    %c0_7 = arith.constant 0 : index
    %5 = vector.load %arg4[%c1, %c0_6, %c0_7] : memref<3x128x128xf32, #tpu.memory_space<vmem>>, vector<1x128x128xf32>
    %6 = vector.shape_cast %5 : vector<1x128x128xf32> to vector<128x128xf32>
    %cst_8 = arith.constant dense<0.000000e+00> : vector<32x128xf32>
    %7 = tpu.matmul %4, %6, %cst_8 {dimension_numbers = #tpu.dot_dimension_numbers<[1], [0], [0], [1], [0, 0, 1, 1], [], []>} : vector<32x128xf32>, vector<128x128xf32>, vector<32x128xf32> -> vector<32x128xf32>
    %8 = arith.addf %3, %7 : vector<32x128xf32>
    %c0_9 = arith.constant 0 : index
    %c0_10 = arith.constant 0 : index
    %9 = vector.load %arg3[%c0_9, %c0_10] : memref<32x128xf32, #tpu.memory_space<vmem>>, vector<32x128xf32>
    %c2 = arith.constant 2 : index
    %c0_11 = arith.constant 0 : index
    %c0_12 = arith.constant 0 : index
    %10 = vector.load %arg4[%c2, %c0_11, %c0_12] : memref<3x128x128xf32, #tpu.memory_space<vmem>>, vector<1x128x128xf32>
    %11 = vector.shape_cast %10 : vector<1x128x128xf32> to vector<128x128xf32>
    %cst_13 = arith.constant dense<0.000000e+00> : vector<32x128xf32>
    %12 = tpu.matmul %9, %11, %cst_13 {dimension_numbers = #tpu.dot_dimension_numbers<[1], [0], [0], [1], [0, 0, 1, 1], [], []>} : vector<32x128xf32>, vector<128x128xf32>, vector<32x128xf32> -> vector<32x128xf32>
    %13 = arith.addf %8, %12 : vector<32x128xf32>
    %cst_14 = arith.constant dense<0.000000e+00> : vector<128xf32>
    %14 = vector.multi_reduction <add>, %13, %cst_14 [0] : vector<32x128xf32> to vector<128xf32>
    %15 = vector.shape_cast %14 : vector<128xf32> to vector<1x128xf32>
    %c0_15 = arith.constant 0 : index
    %c0_16 = arith.constant 0 : index
    %16 = vector.load %arg5[%c0_15, %c0_16] : memref<128x128xf32, #tpu.memory_space<vmem>>, vector<128x128xf32>
    %cst_17 = arith.constant dense<0.000000e+00> : vector<1x128xf32>
    %17 = tpu.matmul %15, %16, %cst_17 {dimension_numbers = #tpu.dot_dimension_numbers<[1], [0], [0], [1], [0, 0, 1, 1], [], []>} : vector<1x128xf32>, vector<128x128xf32>, vector<1x128xf32> -> vector<1x128xf32>
    %cst_18 = arith.constant 0.001953125 : f32
    %18 = vector.broadcast %cst_18 : f32 to vector<1x128xf32>
    %19 = arith.mulf %17, %18 : vector<1x128xf32>
    %20 = vector.broadcast %19 : vector<1x128xf32> to vector<32x128xf32>
    %21 = arith.subf %13, %20 : vector<32x128xf32>
    %22 = arith.mulf %21, %21 : vector<32x128xf32>
    %cst_19 = arith.constant dense<0.000000e+00> : vector<128xf32>
    %23 = vector.multi_reduction <add>, %22, %cst_19 [0] : vector<32x128xf32> to vector<128xf32>
    %24 = vector.shape_cast %23 : vector<128xf32> to vector<1x128xf32>
    %c0_20 = arith.constant 0 : index
    %c0_21 = arith.constant 0 : index
    %25 = vector.load %arg5[%c0_20, %c0_21] : memref<128x128xf32, #tpu.memory_space<vmem>>, vector<128x128xf32>
    %cst_22 = arith.constant dense<0.000000e+00> : vector<1x128xf32>
    %26 = tpu.matmul %24, %25, %cst_22 {dimension_numbers = #tpu.dot_dimension_numbers<[1], [0], [0], [1], [0, 0, 1, 1], [], []>} : vector<1x128xf32>, vector<128x128xf32>, vector<1x128xf32> -> vector<1x128xf32>
    %cst_23 = arith.constant 0.001953125 : f32
    %27 = vector.broadcast %cst_23 : f32 to vector<1x128xf32>
    %28 = arith.mulf %26, %27 : vector<1x128xf32>
    %c0_24 = arith.constant 0 : index
    %c0_25 = arith.constant 0 : index
    %29 = vector.load %arg6[%c0_24, %c0_25] : memref<1x128xf32, #tpu.memory_space<vmem>>, vector<1x128xf32>
    %cst_26 = arith.constant 9.99999974E-6 : f32
    %30 = vector.broadcast %cst_26 : f32 to vector<1x128xf32>
    %31 = arith.addf %28, %30 : vector<1x128xf32>
    %32 = math.rsqrt %31 : vector<1x128xf32>
    %33 = arith.mulf %29, %32 : vector<1x128xf32>
    %34 = vector.broadcast %33 : vector<1x128xf32> to vector<32x128xf32>
    %35 = arith.mulf %21, %34 : vector<32x128xf32>
    %c0_27 = arith.constant 0 : index
    %c0_28 = arith.constant 0 : index
    %36 = vector.load %arg7[%c0_27, %c0_28] : memref<1x128xf32, #tpu.memory_space<vmem>>, vector<1x128xf32>
    %37 = vector.broadcast %36 : vector<1x128xf32> to vector<32x128xf32>
    %38 = arith.addf %35, %37 : vector<32x128xf32>
    %cst_29 = arith.constant 0.000000e+00 : f32
    %39 = vector.broadcast %cst_29 : f32 to vector<32x128xf32>
    %40 = arith.maximumf %38, %39 : vector<32x128xf32>
    %cst_30 = arith.constant 0.000000e+00 : f32
    %41 = vector.broadcast %cst_30 : f32 to vector<1x128xf32>
    %c0_31 = arith.constant 0 : index
    %c0_32 = arith.constant 0 : index
    %c0_33 = arith.constant 0 : index
    %42 = vector.load %arg13[%c0_31, %c0_32, %c0_33] : memref<2x32x128xf32, #tpu.memory_space<vmem>>, vector<1x1x128xf32>
    %43 = vector.shape_cast %42 : vector<1x1x128xf32> to vector<1x128xf32>
    %44 = vector.shape_cast %41 : vector<1x128xf32> to vector<1x1x128xf32>
    tpu.vector_store %arg13[%c0_31, %c0_32, %c0_33], %44 {strides = array<i32>} : memref<2x32x128xf32, #tpu.memory_space<vmem>>, vector<1x1x128xf32>,
    %45 = vector.extract_strided_slice %40 {offsets = [0, 0], sizes = [15, 128], strides = [1, 1]} : vector<32x128xf32> to vector<15x128xf32>
    %c0_34 = arith.constant 0 : index
    %c1_35 = arith.constant 1 : index
    %c0_36 = arith.constant 0 : index
    %46 = vector.load %arg13[%c0_34, %c1_35, %c0_36] : memref<2x32x128xf32, #tpu.memory_space<vmem>>, vector<1x15x128xf32>
    %47 = vector.shape_cast %46 : vector<1x15x128xf32> to vector<15x128xf32>
    %48 = vector.shape_cast %45 : vector<15x128xf32> to vector<1x15x128xf32>
    tpu.vector_store %arg13[%c0_34, %c1_35, %c0_36], %48 {strides = array<i32>} : memref<2x32x128xf32, #tpu.memory_space<vmem>>, vector<1x15x128xf32>,
    %49 = vector.extract_strided_slice %40 {offsets = [1, 0], sizes = [15, 128], strides = [1, 1]} : vector<32x128xf32> to vector<15x128xf32>
    %c1_37 = arith.constant 1 : index
    %c0_38 = arith.constant 0 : index
    %c0_39 = arith.constant 0 : index
    %50 = vector.load %arg13[%c1_37, %c0_38, %c0_39] : memref<2x32x128xf32, #tpu.memory_space<vmem>>, vector<1x15x128xf32>
    %51 = vector.shape_cast %50 : vector<1x15x128xf32> to vector<15x128xf32>
    %52 = vector.shape_cast %49 : vector<15x128xf32> to vector<1x15x128xf32>
    tpu.vector_store %arg13[%c1_37, %c0_38, %c0_39], %52 {strides = array<i32>} : memref<2x32x128xf32, #tpu.memory_space<vmem>>, vector<1x15x128xf32>,
    %c1_40 = arith.constant 1 : index
    %c15 = arith.constant 15 : index
    %c0_41 = arith.constant 0 : index
    %53 = vector.load %arg13[%c1_40, %c15, %c0_41] : memref<2x32x128xf32, #tpu.memory_space<vmem>>, vector<1x1x128xf32>
    %54 = vector.shape_cast %53 : vector<1x1x128xf32> to vector<1x128xf32>
    %55 = vector.shape_cast %41 : vector<1x128xf32> to vector<1x1x128xf32>
    tpu.vector_store %arg13[%c1_40, %c15, %c0_41], %55 {strides = array<i32>} : memref<2x32x128xf32, #tpu.memory_space<vmem>>, vector<1x1x128xf32>,
    %c0_42 = arith.constant 0 : index
    %c16 = arith.constant 16 : index
    %c0_43 = arith.constant 0 : index
    %56 = vector.load %arg13[%c0_42, %c16, %c0_43] : memref<2x32x128xf32, #tpu.memory_space<vmem>>, vector<1x1x128xf32>
    %57 = vector.shape_cast %56 : vector<1x1x128xf32> to vector<1x128xf32>
    %58 = vector.shape_cast %41 : vector<1x128xf32> to vector<1x1x128xf32>
    tpu.vector_store %arg13[%c0_42, %c16, %c0_43], %58 {strides = array<i32>} : memref<2x32x128xf32, #tpu.memory_space<vmem>>, vector<1x1x128xf32>,
    %59 = vector.extract_strided_slice %40 {offsets = [16, 0], sizes = [15, 128], strides = [1, 1]} : vector<32x128xf32> to vector<15x128xf32>
    %c0_44 = arith.constant 0 : index
    %c17 = arith.constant 17 : index
    %c0_45 = arith.constant 0 : index
    %60 = vector.load %arg13[%c0_44, %c17, %c0_45] : memref<2x32x128xf32, #tpu.memory_space<vmem>>, vector<1x15x128xf32>
    %61 = vector.shape_cast %60 : vector<1x15x128xf32> to vector<15x128xf32>
    %62 = vector.shape_cast %59 : vector<15x128xf32> to vector<1x15x128xf32>
    tpu.vector_store %arg13[%c0_44, %c17, %c0_45], %62 {strides = array<i32>} : memref<2x32x128xf32, #tpu.memory_space<vmem>>, vector<1x15x128xf32>,
    %63 = vector.extract_strided_slice %40 {offsets = [17, 0], sizes = [15, 128], strides = [1, 1]} : vector<32x128xf32> to vector<15x128xf32>
    %c1_46 = arith.constant 1 : index
    %c16_47 = arith.constant 16 : index
    %c0_48 = arith.constant 0 : index
    %64 = vector.load %arg13[%c1_46, %c16_47, %c0_48] : memref<2x32x128xf32, #tpu.memory_space<vmem>>, vector<1x15x128xf32>
    %65 = vector.shape_cast %64 : vector<1x15x128xf32> to vector<15x128xf32>
    %66 = vector.shape_cast %63 : vector<15x128xf32> to vector<1x15x128xf32>
    tpu.vector_store %arg13[%c1_46, %c16_47, %c0_48], %66 {strides = array<i32>} : memref<2x32x128xf32, #tpu.memory_space<vmem>>, vector<1x15x128xf32>,
    %c1_49 = arith.constant 1 : index
    %c31 = arith.constant 31 : index
    %c0_50 = arith.constant 0 : index
    %67 = vector.load %arg13[%c1_49, %c31, %c0_50] : memref<2x32x128xf32, #tpu.memory_space<vmem>>, vector<1x1x128xf32>
    %68 = vector.shape_cast %67 : vector<1x1x128xf32> to vector<1x128xf32>
    %69 = vector.shape_cast %41 : vector<1x128xf32> to vector<1x1x128xf32>
    tpu.vector_store %arg13[%c1_49, %c31, %c0_50], %69 {strides = array<i32>} : memref<2x32x128xf32, #tpu.memory_space<vmem>>, vector<1x1x128xf32>,
    %c1_51 = arith.constant 1 : index
    %c0_52 = arith.constant 0 : index
    %c0_53 = arith.constant 0 : index
    %70 = vector.load %arg8[%c1_51, %c0_52, %c0_53] : memref<3x128x128xf32, #tpu.memory_space<vmem>>, vector<1x128x128xf32>
    %71 = vector.shape_cast %70 : vector<1x128x128xf32> to vector<128x128xf32>
    %cst_54 = arith.constant dense<0.000000e+00> : vector<32x128xf32>
    %72 = tpu.matmul %40, %71, %cst_54 {dimension_numbers = #tpu.dot_dimension_numbers<[1], [0], [0], [1], [0, 0, 1, 1], [], []>} : vector<32x128xf32>, vector<128x128xf32>, vector<32x128xf32> -> vector<32x128xf32>
    %c0_55 = arith.constant 0 : index
    %c0_56 = arith.constant 0 : index
    %c0_57 = arith.constant 0 : index
    %73 = vector.load %arg13[%c0_55, %c0_56, %c0_57] : memref<2x32x128xf32, #tpu.memory_space<vmem>>, vector<1x32x128xf32>
    %74 = vector.shape_cast %73 : vector<1x32x128xf32> to vector<32x128xf32>
    %c0_58 = arith.constant 0 : index
    %c0_59 = arith.constant 0 : index
    %c0_60 = arith.constant 0 : index
    %75 = vector.load %arg8[%c0_58, %c0_59, %c0_60] : memref<3x128x128xf32, #tpu.memory_space<vmem>>, vector<1x128x128xf32>
    %76 = vector.shape_cast %75 : vector<1x128x128xf32> to vector<128x128xf32>
    %cst_61 = arith.constant dense<0.000000e+00> : vector<32x128xf32>
    %77 = tpu.matmul %74, %76, %cst_61 {dimension_numbers = #tpu.dot_dimension_numbers<[1], [0], [0], [1], [0, 0, 1, 1], [], []>} : vector<32x128xf32>, vector<128x128xf32>, vector<32x128xf32> -> vector<32x128xf32>
    %78 = arith.addf %72, %77 : vector<32x128xf32>
    %c1_62 = arith.constant 1 : index
    %c0_63 = arith.constant 0 : index
    %c0_64 = arith.constant 0 : index
    %79 = vector.load %arg13[%c1_62, %c0_63, %c0_64] : memref<2x32x128xf32, #tpu.memory_space<vmem>>, vector<1x32x128xf32>
    %80 = vector.shape_cast %79 : vector<1x32x128xf32> to vector<32x128xf32>
    %c2_65 = arith.constant 2 : index
    %c0_66 = arith.constant 0 : index
    %c0_67 = arith.constant 0 : index
    %81 = vector.load %arg8[%c2_65, %c0_66, %c0_67] : memref<3x128x128xf32, #tpu.memory_space<vmem>>, vector<1x128x128xf32>
    %82 = vector.shape_cast %81 : vector<1x128x128xf32> to vector<128x128xf32>
    %cst_68 = arith.constant dense<0.000000e+00> : vector<32x128xf32>
    %83 = tpu.matmul %80, %82, %cst_68 {dimension_numbers = #tpu.dot_dimension_numbers<[1], [0], [0], [1], [0, 0, 1, 1], [], []>} : vector<32x128xf32>, vector<128x128xf32>, vector<32x128xf32> -> vector<32x128xf32>
    %84 = arith.addf %78, %83 : vector<32x128xf32>
    %cst_69 = arith.constant dense<0.000000e+00> : vector<128xf32>
    %85 = vector.multi_reduction <add>, %84, %cst_69 [0] : vector<32x128xf32> to vector<128xf32>
    %86 = vector.shape_cast %85 : vector<128xf32> to vector<1x128xf32>
    %c0_70 = arith.constant 0 : index
    %c0_71 = arith.constant 0 : index
    %87 = vector.load %arg9[%c0_70, %c0_71] : memref<128x128xf32, #tpu.memory_space<vmem>>, vector<128x128xf32>
    %cst_72 = arith.constant dense<0.000000e+00> : vector<1x128xf32>
    %88 = tpu.matmul %86, %87, %cst_72 {dimension_numbers = #tpu.dot_dimension_numbers<[1], [0], [0], [1], [0, 0, 1, 1], [], []>} : vector<1x128xf32>, vector<128x128xf32>, vector<1x128xf32> -> vector<1x128xf32>
    %cst_73 = arith.constant 0.001953125 : f32
    %89 = vector.broadcast %cst_73 : f32 to vector<1x128xf32>
    %90 = arith.mulf %88, %89 : vector<1x128xf32>
    %91 = vector.broadcast %90 : vector<1x128xf32> to vector<32x128xf32>
    %92 = arith.subf %84, %91 : vector<32x128xf32>
    %93 = arith.mulf %92, %92 : vector<32x128xf32>
    %cst_74 = arith.constant dense<0.000000e+00> : vector<128xf32>
    %94 = vector.multi_reduction <add>, %93, %cst_74 [0] : vector<32x128xf32> to vector<128xf32>
    %95 = vector.shape_cast %94 : vector<128xf32> to vector<1x128xf32>
    %c0_75 = arith.constant 0 : index
    %c0_76 = arith.constant 0 : index
    %96 = vector.load %arg9[%c0_75, %c0_76] : memref<128x128xf32, #tpu.memory_space<vmem>>, vector<128x128xf32>
    %cst_77 = arith.constant dense<0.000000e+00> : vector<1x128xf32>
    %97 = tpu.matmul %95, %96, %cst_77 {dimension_numbers = #tpu.dot_dimension_numbers<[1], [0], [0], [1], [0, 0, 1, 1], [], []>} : vector<1x128xf32>, vector<128x128xf32>, vector<1x128xf32> -> vector<1x128xf32>
    %cst_78 = arith.constant 0.001953125 : f32
    %98 = vector.broadcast %cst_78 : f32 to vector<1x128xf32>
    %99 = arith.mulf %97, %98 : vector<1x128xf32>
    %c0_79 = arith.constant 0 : index
    %c0_80 = arith.constant 0 : index
    %100 = vector.load %arg10[%c0_79, %c0_80] : memref<1x128xf32, #tpu.memory_space<vmem>>, vector<1x128xf32>
    %cst_81 = arith.constant 9.99999974E-6 : f32
    %101 = vector.broadcast %cst_81 : f32 to vector<1x128xf32>
    %102 = arith.addf %99, %101 : vector<1x128xf32>
    %103 = math.rsqrt %102 : vector<1x128xf32>
    %104 = arith.mulf %100, %103 : vector<1x128xf32>
    %105 = vector.broadcast %104 : vector<1x128xf32> to vector<32x128xf32>
    %106 = arith.mulf %92, %105 : vector<32x128xf32>
    %c0_82 = arith.constant 0 : index
    %c0_83 = arith.constant 0 : index
    %107 = vector.load %arg11[%c0_82, %c0_83] : memref<1x128xf32, #tpu.memory_space<vmem>>, vector<1x128xf32>
    %108 = vector.broadcast %107 : vector<1x128xf32> to vector<32x128xf32>
    %109 = arith.addf %106, %108 : vector<32x128xf32>
    %cst_84 = arith.constant 0.000000e+00 : f32
    %110 = vector.broadcast %cst_84 : f32 to vector<32x128xf32>
    %111 = arith.maximumf %109, %110 : vector<32x128xf32>
    %c0_85 = arith.constant 0 : index
    %c0_86 = arith.constant 0 : index
    %112 = vector.load %arg12[%c0_85, %c0_86] : memref<32x128xf32, #tpu.memory_space<vmem>>, vector<32x128xf32>
    tpu.vector_store %arg12[%c0_85, %c0_86], %111 {strides = array<i32>} : memref<32x128xf32, #tpu.memory_space<vmem>>, vector<32x128xf32>,
    return
  }
  func.func @transform_0(%arg0: i32) -> (i32, i32) {
    %c0_i32 = arith.constant 0 : i32
    %c0_i32_0 = arith.constant 0 : i32
    %c0_i32_1 = arith.constant 0 : i32
    return %c0_i32, %c0_i32_0 : i32, i32
  }
  func.func @transform_1(%arg0: i32) -> (i32, i32) {
    %c0_i32 = arith.constant 0 : i32
    %c0_i32_0 = arith.constant 0 : i32
    %c0_i32_1 = arith.constant 0 : i32
    return %c0_i32, %c0_i32_0 : i32, i32
  }
  func.func @transform_2(%arg0: i32) -> (i32, i32) {
    %c0_i32 = arith.constant 0 : i32
    %c0_i32_0 = arith.constant 0 : i32
    %c0_i32_1 = arith.constant 0 : i32
    return %c0_i32, %c0_i32_0 : i32, i32
  }
  func.func @transform_3(%arg0: i32) -> (i32, i32, i32) {
    %c0_i32 = arith.constant 0 : i32
    %c0_i32_0 = arith.constant 0 : i32
    %c0_i32_1 = arith.constant 0 : i32
    %c0_i32_2 = arith.constant 0 : i32
    return %c0_i32, %c0_i32_0, %c0_i32_1 : i32, i32, i32
  }
  func.func @transform_4(%arg0: i32) -> (i32, i32) {
    %c0_i32 = arith.constant 0 : i32
    %c0_i32_0 = arith.constant 0 : i32
    %c0_i32_1 = arith.constant 0 : i32
    return %c0_i32, %c0_i32_0 : i32, i32
  }
  func.func @transform_5(%arg0: i32) -> (i32, i32) {
    %c0_i32 = arith.constant 0 : i32
    %c0_i32_0 = arith.constant 0 : i32
    %c0_i32_1 = arith.constant 0 : i32
    return %c0_i32, %c0_i32_0 : i32, i32
  }
  func.func @transform_6(%arg0: i32) -> (i32, i32) {
    %c0_i32 = arith.constant 0 : i32
    %c0_i32_0 = arith.constant 0 : i32
    %c0_i32_1 = arith.constant 0 : i32
    return %c0_i32, %c0_i32_0 : i32, i32
  }
  func.func @transform_7(%arg0: i32) -> (i32, i32, i32) {
    %c0_i32 = arith.constant 0 : i32
    %c0_i32_0 = arith.constant 0 : i32
    %c0_i32_1 = arith.constant 0 : i32
    %c0_i32_2 = arith.constant 0 : i32
    return %c0_i32, %c0_i32_0, %c0_i32_1 : i32, i32, i32
  }
  func.func @transform_8(%arg0: i32) -> (i32, i32) {
    %c0_i32 = arith.constant 0 : i32
    %c0_i32_0 = arith.constant 0 : i32
    %c0_i32_1 = arith.constant 0 : i32
    return %c0_i32, %c0_i32_0 : i32, i32
  }
  func.func @transform_9(%arg0: i32) -> (i32, i32) {
    %c0_i32 = arith.constant 0 : i32
    %c0_i32_0 = arith.constant 0 : i32
    %c0_i32_1 = arith.constant 0 : i32
    return %c0_i32, %c0_i32_0 : i32, i32
  }
  func.func @transform_10(%arg0: i32) -> (i32, i32) {
    %c0_i32 = arith.constant 0 : i32
    %c0_i32_0 = arith.constant 0 : i32
    %c0_i32_1 = arith.constant 0 : i32
    return %c0_i32, %c0_i32_0 : i32, i32
  }
  func.func @transform_11(%arg0: i32) -> (i32, i32) {
    %c0_i32 = arith.constant 0 : i32
    %c0_i32_0 = arith.constant 0 : i32
    %c0_i32_1 = arith.constant 0 : i32
    return %c0_i32, %c0_i32_0 : i32, i32
  }
}

</mosaic_0001>

<bundles_post_ra>
// kernel: tpu_custom_call.1
= control target key start
LH: loop header
LB: loop body
LE: loop exit
PB: predicated region body
PF: predicated region fallthrough
CT: control target
= control target key end

     0   :  { %16 = vsyncpa [#allocation4], 0  ;;  %s2221_s0 = inlined_call_operand.hbm [shape: f32[32,128], index: 0, kind: input, shape index: {}]   ;;  %s2222_s1 = inlined_call_operand.hbm [shape: f32[32,128], index: 1, kind: input, shape index: {}]   ;;  %s2223_s2 = inlined_call_operand.hbm [shape: f32[32,128], index: 2, kind: input, shape index: {}]   ;;  %s2224_s3 = inlined_call_operand.hbm [shape: f32[3,128,128], index: 3, kind: input, shape index: {}]   ;;  %s2225_s4 = inlined_call_operand.hbm [shape: f32[128,128], index: 4, kind: input, shape index: {}]   ;;  %s2226_s5 = inlined_call_operand.vmem [shape: f32[1,128], index: 5, kind: input, shape index: {}]   ;;  %s2227_s6 = inlined_call_operand.vmem [shape: f32[1,128], index: 6, kind: input, shape index: {}]   ;;  %s2228_s7 = inlined_call_operand.hbm [shape: f32[3,128,128], index: 7, kind: input, shape index: {}]   ;;  %s2229_s8 = inlined_call_operand.hbm [shape: f32[128,128], index: 8, kind: input, shape index: {}]   ;;  %s2230_s9 = inlined_call_operand.vmem [shape: f32[1,128], index: 9, kind: input, shape index: {}]   ;;  %s2231_s10 = inlined_call_operand.vmem [shape: f32[1,128], index: 10, kind: input, shape index: {}]   ;;  %s2232_s11 = inlined_call_operand.hbm [shape: f32[32,128], index: 11, kind: output, shape index: {}]  }
   0x1   :  { %17 = vsyncpa [#allocation7], 0 }
   0x2   :  { %18 = vsyncpa [#allocation10], 0 }
   0x3   :  { %19 = vsyncpa [#allocation13], 0 }
   0x4   :  { %20 = vsyncpa [#allocation5], 0  ;;  %s1987_s17 = smov [#allocation6]   ;;  %s1988_s19 = smov [#allocation9]  }
   0x5   :  { %s38_s18 = sshll.u32 %s1987_s17, 4  ;;  %s62_s20 = sshll.u32 %s1988_s19, 4  ;;  %s39_s18 = int_to_ptr.vmem [resolvable:$true] %s38_s18  ;;  %s63_s20 = int_to_ptr.vmem [resolvable:$true] %s62_s20 }
   0x6   :  { %s1825_s21 = scalar_lea.vmem %s39_s18, 512  ;;  %p1830_p1 = scmp.lt.s32.totalorder %s39_s18, %s39_s18 }
   0x7   :  { %p1826_p0 = scmp.ne.s32.totalorder %s39_s18, %s1825_s21  ;;  %p1831_p2 = scmp.lt.s32.totalorder %s1825_s21, %s1825_s21 }
   0x9   :  { %p1832_p3 = por %p1831_p2, %p1830_p1 }
   0xb   :  { %p1833_p4 = pnand %p1832_p3, %p1826_p0 }
   0xd   :  { %1836 = shalt.err (!%p1833_p4)
}
   0xe   :  { %s1989_s22 = smov 128   ;;  %s1990_s23 = smov 8  }
   0xf   :  { %44 = dma.hbm_to_vmem [thread:$0]  %s2222_s1, 512, %s39_s18, [#allocation7], %s1989_s22, %s1989_s22, %s1990_s23  }
  0x10   :  { %s1845_s26 = scalar_lea.vmem %s63_s20, 6144  ;;  %p1850_p6 = scmp.lt.s32.totalorder %s63_s20, %s63_s20 }
  0x11   :  { %p1846_p5 = scmp.ne.s32.totalorder %s63_s20, %s1845_s26  ;;  %p1851_p7 = scmp.lt.s32.totalorder %s1845_s26, %s1845_s26 }
  0x13   :  { %p1852_p8 = por %p1851_p7, %p1850_p6 }
  0x15   :  { %p1853_p9 = pnand %p1852_p8, %p1846_p5 }
  0x17   :  { %1856 = shalt.err (!%p1853_p9)
}
  0x18   :  { %68 = dma.hbm_to_vmem [thread:$0]  %s2224_s3, 6144, %s63_s20, [#allocation10], %s1989_s22, %s1989_s22, %s1990_s23  }
  0x19   :  { %s1991_s29 = smov [#allocation12]   ;;  %s1992_s12 = smov [#allocation3]  }
  0x1a   :  { %s90_s30 = sshll.u32 %s1991_s29, 4  ;;  %s26_s13 = sshll.u32 %s1992_s12, 4  ;;  %s91_s30 = int_to_ptr.vmem [resolvable:$true] %s90_s30  ;;  %s27_s13 = int_to_ptr.vmem [resolvable:$true] %s26_s13 }
  0x1b   :  { %s1865_s1 = scalar_lea.vmem %s91_s30, 6144  ;;  %p1870_p11 = scmp.lt.s32.totalorder %s91_s30, %s91_s30 }
  0x1c   :  { %p1866_p10 = scmp.ne.s32.totalorder %s91_s30, %s1865_s1  ;;  %p1871_p12 = scmp.lt.s32.totalorder %s1865_s1, %s1865_s1 }
  0x1e   :  { %p1872_p13 = por %p1871_p12, %p1870_p11 }
  0x20   :  { %p1873_p0 = pnand %p1872_p13, %p1866_p10 }
  0x22   :  { %1876 = shalt.err (!%p1873_p0)
}
  0x23   :  { %96 = dma.hbm_to_vmem [thread:$0]  %s2228_s7, 6144, %s91_s30, [#allocation13], %s1989_s22, %s1989_s22, %s1990_s23  }
  0x24   :  { %s1885_s3 = scalar_lea.vmem %s27_s13, 512  ;;  %p1890_p2 = scmp.lt.s32.totalorder %s27_s13, %s27_s13 }
  0x25   :  { %p1886_p1 = scmp.ne.s32.totalorder %s27_s13, %s1885_s3  ;;  %p1891_p3 = scmp.lt.s32.totalorder %s1885_s3, %s1885_s3 }
  0x27   :  { %p1892_p4 = por %p1891_p3, %p1890_p2 }
  0x29   :  { %p1893_p5 = pnand %p1892_p4, %p1886_p1 }
  0x2b   :  { %1896 = shalt.err (!%p1893_p5)
}
  0x2c   :  { %32 = dma.hbm_to_vmem [thread:$0]  %s2221_s0, 512, %s27_s13, [#allocation4], %s1989_s22, %s1989_s22, %s1990_s23  }
  0x2d   :  { %s1993_s18 = smov [#allocation8]   ;;  %s1994_s20 = smov [#allocation11]  }
  0x2e   :  { %s50_s19 = sshll.u32 %s1993_s18, 4  ;;  %s74_s21 = sshll.u32 %s1994_s20, 4  ;;  %s51_s19 = int_to_ptr.vmem [resolvable:$true] %s50_s19  ;;  %s75_s21 = int_to_ptr.vmem [resolvable:$true] %s74_s21 }
  0x2f   :  { %s1905_s7 = scalar_lea.vmem %s51_s19, 512  ;;  %p1910_p7 = scmp.lt.s32.totalorder %s51_s19, %s51_s19 }
  0x30   :  { %p1906_p6 = scmp.ne.s32.totalorder %s51_s19, %s1905_s7  ;;  %p1911_p8 = scmp.lt.s32.totalorder %s1905_s7, %s1905_s7 }
  0x32   :  { %p1912_p9 = por %p1911_p8, %p1910_p7 }
  0x34   :  { %p1913_p10 = pnand %p1912_p9, %p1906_p6 }
  0x36   :  { %1916 = shalt.err (!%p1913_p10)
}
  0x37   :  { %56 = dma.hbm_to_vmem [thread:$0]  %s2223_s2, 512, %s51_s19, [#allocation7], %s1989_s22, %s1989_s22, %s1990_s23  }
  0x38   :  { %s1925_s0 = scalar_lea.vmem %s75_s21, 2048  ;;  %p1930_p12 = scmp.lt.s32.totalorder %s75_s21, %s75_s21 }
  0x39   :  { %p1926_p11 = scmp.ne.s32.totalorder %s75_s21, %s1925_s0  ;;  %p1931_p13 = scmp.lt.s32.totalorder %s1925_s0, %s1925_s0 }
  0x3b   :  { %p1932_p0 = por %p1931_p13, %p1930_p12 }
  0x3d   :  { %p1933_p1 = pnand %p1932_p0, %p1926_p11 }
  0x3f   :  { %1936 = shalt.err (!%p1933_p1)
}
  0x40   :  { %80 = dma.hbm_to_vmem [thread:$0]  %s2225_s4, 2048, %s75_s21, [#allocation10], %s1989_s22, %s1989_s22, %s1990_s23  }
  0x41   :  { %s1995_s28 = smov [#allocation14]  }
  0x42   :  { %s102_s29 = sshll.u32 %s1995_s28, 4  ;;  %s103_s29 = int_to_ptr.vmem [resolvable:$true] %s102_s29 }
  0x43   :  { %s1945_s30 = scalar_lea.vmem %s103_s29, 2048  ;;  %p1950_p3 = scmp.lt.s32.totalorder %s103_s29, %s103_s29 }
  0x44   :  { %p1946_p2 = scmp.ne.s32.totalorder %s103_s29, %s1945_s30  ;;  %p1951_p4 = scmp.lt.s32.totalorder %s1945_s30, %s1945_s30 }
  0x46   :  { %p1952_p5 = por %p1951_p4, %p1950_p3 }
  0x48   :  { %p1953_p6 = pnand %p1952_p5, %p1946_p2 }
  0x4a   :  { %1956 = shalt.err (!%p1953_p6)
}
  0x4b   :  { %108 = dma.hbm_to_vmem [thread:$0]  %s2229_s8, 2048, %s103_s29, [#allocation13], %s1989_s22, %s1989_s22, %s1990_s23  }
  0x4c   :  { %1977 = dma.done.wait [#allocation4], 512  }
  0x4d   :  { %1978 = vsyncadd [#allocation4], 4294966784 }
  0x4e   :  { %1979 = dma.done.wait [#allocation7], 1024  }
  0x4f   :  { %1980 = vsyncadd [#allocation7], 4294966272 }
  0x50   :  { %1981 = dma.done.wait [#allocation10], 8192  }
  0x51   :  { %1982 = vsyncadd [#allocation10], 4294959104 }
  0x52   :  { %1983 = dma.done.wait [#allocation13], 8192  }
  0x53   :  { %1984 = vsyncadd [#allocation13], 4294959104  ;;  %v174_v0 = vld [vmem:[#allocation9 + $0xf8] sm:$0xff]  ;;  %v173_v2 = vld [vmem:[#allocation9 + $0xf0] sm:$0xff]  ;;  %v1996_v60 = vmov 0.0   ;;  %vm1997_vm0 = vmmov 0  }
  0x54   :  { %v153_v1 = vld [vmem:[#allocation9 + $0x78] sm:$0xff]  ;;  %1433 = vmatprep.subr.mxu0 %v174_v0  ;;  %v152_v3 = vld [vmem:[#allocation9 + $0x70] sm:$0xff]  ;;  %v172_v4 = vld [vmem:[#allocation9 + $0xe8] sm:$0xff]  ;;  %672 = vst [vmem:[#allocation2] sm:$0x1] %v1996_v60  ;;  %s1998_s3 = smov [#allocation15]  }
  0x55   :  { %1471 = vmatprep.subr.mxu1 %v153_v1  ;;  %1434 = vmatpush3.msra.mxu0 %v174_v0  ;;  %v151_v5 = vld [vmem:[#allocation9 + $0x68] sm:$0xff]  ;;  %v171_v6 = vld [vmem:[#allocation9 + $0xe0] sm:$0xff]  ;;  %v170_v8 = vld [vmem:[#allocation9 + $0xd8] sm:$0xff]  ;;  %678 = vst [vmem:[#allocation2 + $0x2f] sm:$0x1] %v1996_v60  ;;  %s1228_s16 = sshll.u32 %s1998_s3, 4  ;;  %s1229_s16 = int_to_ptr.vmem [resolvable:$true] %s1228_s16 }
  0x56   :  { %1472 = vmatpush3.msra.mxu1 %v153_v1  ;;  %1435 = vmatprep.subr.mxu0 %v173_v2  ;;  %v150_v7 = vld [vmem:[#allocation9 + $0x60] sm:$0xff]  ;;  %v149_v9 = vld [vmem:[#allocation9 + $0x58] sm:$0xff]  ;;  %v169_v10 = vld [vmem:[#allocation9 + $0xd0] sm:$0xff]  ;;  %679 = vst [vmem:[#allocation2 + $0x10] sm:$0x1] %v1996_v60  ;;  %p1962_p8 = scmp.lt.s32.totalorder %s1229_s16, %s1229_s16 }
  0x57   :  { %1473 = vmatprep.subr.mxu1 %v152_v3  ;;  %1436 = vmatpush3.msra.mxu0 %v173_v2  ;;  %v148_v11 = vld [vmem:[#allocation9 + $0x50] sm:$0xff]  ;;  %v168_v12 = vld [vmem:[#allocation9 + $0xc8] sm:$0xff]  ;;  %v167_v14 = vld [vmem:[#allocation9 + $0xc0] sm:$0xff]  ;;  %684 = vst [vmem:[#allocation2 + $0x3f] sm:$0x1] %v1996_v60 }
  0x58   :  { %1474 = vmatpush3.msra.mxu1 %v152_v3  ;;  %1437 = vmatprep.subr.mxu0 %v172_v4  ;;  %v147_v13 = vld [vmem:[#allocation9 + $0x48] sm:$0xff]  ;;  %v146_v15 = vld [vmem:[#allocation9 + $0x40] sm:$0xff]  ;;  %v166_v16 = vld [vmem:[#allocation9 + $0xb8] sm:$0xff] }
  0x59   :  { %1475 = vmatprep.subr.mxu1 %v151_v5  ;;  %1438 = vmatpush3.msra.mxu0 %v172_v4  ;;  %v145_v17 = vld [vmem:[#allocation9 + $0x38] sm:$0xff]  ;;  %v165_v18 = vld [vmem:[#allocation9 + $0xb0] sm:$0xff]  ;;  %v164_v20 = vld [vmem:[#allocation9 + $0xa8] sm:$0xff] }
  0x5a   :  { %1476 = vmatpush3.msra.mxu1 %v151_v5  ;;  %1439 = vmatprep.subr.mxu0 %v171_v6  ;;  %v144_v19 = vld [vmem:[#allocation9 + $0x30] sm:$0xff]  ;;  %v143_v21 = vld [vmem:[#allocation9 + $0x28] sm:$0xff]  ;;  %v163_v22 = vld [vmem:[#allocation9 + $0xa0] sm:$0xff] }
  0x5b   :  { %1477 = vmatprep.subr.mxu1 %v150_v7  ;;  %1440 = vmatpush3.msra.mxu0 %v171_v6  ;;  %v142_v23 = vld [vmem:[#allocation9 + $0x20] sm:$0xff]  ;;  %v162_v24 = vld [vmem:[#allocation9 + $0x98] sm:$0xff]  ;;  %v161_v26 = vld [vmem:[#allocation9 + $0x90] sm:$0xff] }
  0x5c   :  { %1478 = vmatpush3.msra.mxu1 %v150_v7  ;;  %1441 = vmatprep.subr.mxu0 %v170_v8  ;;  %v141_v25 = vld [vmem:[#allocation9 + $0x18] sm:$0xff]  ;;  %v140_v27 = vld [vmem:[#allocation9 + $0x10] sm:$0xff]  ;;  %v160_v28 = vld [vmem:[#allocation9 + $0x88] sm:$0xff] }
  0x5d   :  { %1479 = vmatprep.subr.mxu1 %v149_v9  ;;  %1442 = vmatpush3.msra.mxu0 %v170_v8  ;;  %v139_v29 = vld [vmem:[#allocation9 + $0x8] sm:$0xff]  ;;  %v159_v30 = vld [vmem:[#allocation9 + $0x80] sm:$0xff]  ;;  %v365_v36 = vld [vmem:[#allocation9 + $0x178] sm:$0xff] }
  0x5e   :  { %1480 = vmatpush3.msra.mxu1 %v149_v9  ;;  %1443 = vmatprep.subr.mxu0 %v169_v10  ;;  %v138_v31 = vld [vmem:[#allocation9] sm:$0xff]  ;;  %v155_v34 = vld [vmem:[#allocation6 + $0x8] sm:$0xff]  ;;  %v156_v37 = vld [vmem:[#allocation6 + $0x10] sm:$0xff] }
  0x5f   :  { %1481 = vmatprep.subr.mxu1 %v148_v11  ;;  %1444 = vmatpush3.msra.mxu0 %v169_v10  ;;  %v154_v32 = vld [vmem:[#allocation6] sm:$0xff]  ;;  %v135_v35 = vld [vmem:[#allocation3 + $0x8] sm:$0xff]  ;;  %v136_v38 = vld [vmem:[#allocation3 + $0x10] sm:$0xff] }
  0x60   :  { %1482 = vmatpush3.msra.mxu1 %v148_v11  ;;  %1445 = vmatprep.subr.mxu0 %v168_v12  ;;  %v134_v33 = vld [vmem:[#allocation3] sm:$0xff]  ;;  %v364_v39 = vld [vmem:[#allocation9 + $0x170] sm:$0xff]  ;;  %v137_v40 = vld [vmem:[#allocation3 + $0x18] sm:$0xff] }
  0x61   :  { %1483 = vmatprep.subr.mxu1 %v147_v13  ;;  %1446 = vmatpush3.msra.mxu0 %v168_v12  ;;  %v363_v41 = vld [vmem:[#allocation9 + $0x168] sm:$0xff]  ;;  %v157_v42 = vld [vmem:[#allocation6 + $0x18] sm:$0xff]  ;;  %v345_v43 = vld [vmem:[#allocation8] sm:$0xff] }
  0x62   :  { %1484 = vmatpush3.msra.mxu1 %v147_v13  ;;  %1447 = vmatprep.subr.mxu0 %v167_v14  ;;  %v362_v44 = vld [vmem:[#allocation9 + $0x160] sm:$0xff]  ;;  %v361_v45 = vld [vmem:[#allocation9 + $0x158] sm:$0xff]  ;;  %v360_v46 = vld [vmem:[#allocation9 + $0x150] sm:$0xff] }
  0x63   :  { %1485 = vmatprep.subr.mxu1 %v146_v15  ;;  %1448 = vmatpush3.msra.mxu0 %v167_v14  ;;  %v359_v47 = vld [vmem:[#allocation9 + $0x148] sm:$0xff]  ;;  %v358_v48 = vld [vmem:[#allocation9 + $0x140] sm:$0xff]  ;;  %v357_v49 = vld [vmem:[#allocation9 + $0x138] sm:$0xff] }
  0x64   :  { %1486 = vmatpush3.msra.mxu1 %v146_v15  ;;  %1449 = vmatprep.subr.mxu0 %v166_v16  ;;  %v356_v50 = vld [vmem:[#allocation9 + $0x130] sm:$0xff]  ;;  %v355_v51 = vld [vmem:[#allocation9 + $0x128] sm:$0xff]  ;;  %v354_v52 = vld [vmem:[#allocation9 + $0x120] sm:$0xff] }
  0x65   :  { %1487 = vmatprep.subr.mxu1 %v145_v17  ;;  %1450 = vmatpush3.msra.mxu0 %v166_v16  ;;  %v353_v53 = vld [vmem:[#allocation9 + $0x118] sm:$0xff]  ;;  %v352_v54 = vld [vmem:[#allocation9 + $0x110] sm:$0xff]  ;;  %v351_v55 = vld [vmem:[#allocation9 + $0x108] sm:$0xff] }
  0x66   :  { %1488 = vmatpush3.msra.mxu1 %v145_v17  ;;  %1451 = vmatprep.subr.mxu0 %v165_v18  ;;  %v350_v56 = vld [vmem:[#allocation9 + $0x100] sm:$0xff]  ;;  %v346_v57 = vld [vmem:[#allocation8 + $0x8] sm:$0xff]  ;;  %v347_v58 = vld [vmem:[#allocation8 + $0x10] sm:$0xff] }
  0x67   :  { %1489 = vmatprep.subr.mxu1 %v144_v19  ;;  %1452 = vmatpush3.msra.mxu0 %v165_v18  ;;  %v348_v59 = vld [vmem:[#allocation8 + $0x18] sm:$0xff]  ;;  %v478_v62 = vld [vmem:[#allocation11 + $0x70] sm:$0xff]  ;;  %v477_v63 = vld [vmem:[#allocation11 + $0x68] sm:$0xff] }
  0x68   :  { %1490 = vmatpush3.msra.mxu1 %v144_v19  ;;  %1453 = vmatprep.subr.mxu0 %v164_v20  ;;  %v479_v61 = vld [vmem:[#allocation11 + $0x78] sm:$0xff]  ;;  %v476_v0 = vld [vmem:[#allocation11 + $0x60] sm:$0xff]  ;;  %v474_v2 = vld [vmem:[#allocation11 + $0x50] sm:$0xff] }
  0x69   :  { %1491 = vmatprep.subr.mxu1 %v143_v21  ;;  %1454 = vmatpush3.msra.mxu0 %v164_v20  ;;  %v475_v1 = vld [vmem:[#allocation11 + $0x58] sm:$0xff]  ;;  %v473_v3 = vld [vmem:[#allocation11 + $0x48] sm:$0xff]  ;;  %v472_v4 = vld [vmem:[#allocation11 + $0x40] sm:$0xff] }
  0x6a   :  { %1492 = vmatpush3.msra.mxu1 %v143_v21  ;;  %1455 = vmatprep.subr.mxu0 %v163_v22  ;;  %v471_v5 = vld [vmem:[#allocation11 + $0x38] sm:$0xff]  ;;  %v470_v6 = vld [vmem:[#allocation11 + $0x30] sm:$0xff]  ;;  %v469_v7 = vld [vmem:[#allocation11 + $0x28] sm:$0xff] }
  0x6b   :  { %1493 = vmatprep.subr.mxu1 %v142_v23  ;;  %1456 = vmatpush3.msra.mxu0 %v163_v22  ;;  %v468_v8 = vld [vmem:[#allocation11 + $0x20] sm:$0xff]  ;;  %v467_v9 = vld [vmem:[#allocation11 + $0x18] sm:$0xff]  ;;  %v466_v10 = vld [vmem:[#allocation11 + $0x10] sm:$0xff] }
  0x6c   :  { %1494 = vmatpush3.msra.mxu1 %v142_v23  ;;  %1457 = vmatprep.subr.mxu0 %v162_v24  ;;  %v465_v11 = vld [vmem:[#allocation11 + $0x8] sm:$0xff]  ;;  %v464_v12 = vld [vmem:[#allocation11] sm:$0xff] }
  0x6d   :  { %1495 = vmatprep.subr.mxu1 %v141_v25  ;;  %1458 = vmatpush3.msra.mxu0 %v162_v24 }
  0x6e   :  { %1496 = vmatpush3.msra.mxu1 %v141_v25  ;;  %1459 = vmatprep.subr.mxu0 %v161_v26 }
  0x6f   :  { %1497 = vmatprep.subr.mxu1 %v140_v27  ;;  %1460 = vmatpush3.msra.mxu0 %v161_v26 }
  0x70   :  { %1498 = vmatpush3.msra.mxu1 %v140_v27  ;;  %1461 = vmatprep.subr.mxu0 %v160_v28 }
  0x71   :  { %1499 = vmatprep.subr.mxu1 %v139_v29  ;;  %1462 = vmatpush3.msra.mxu0 %v160_v28 }
  0x72   :  { %1500 = vmatpush3.msra.mxu1 %v139_v29  ;;  %1463 = vmatprep.subr.mxu0 %v159_v30 }
  0x73   :  { %1501 = vmatprep.subr.mxu1 %v138_v31  ;;  %1464 = vmatpush3.msra.mxu0 %v159_v30 }
  0x74   :  { %1465 = vmatprep.mubr.f32.mxu0 %v154_v32  ;;  %1502 = vmatpush3.msra.mxu1 %v138_v31 }
  0x75   :  { %1503 = vmatprep.mubr.f32.mxu1 %v134_v33  ;;  %1466 = vmatmul.mubr.f32.vlgmr.msra.gmra.mxu0 %v155_v34 }
  0x76   :  { %1504 = vmatmul.mubr.f32.vlgmr.msra.gmra.mxu1 %v135_v35  ;;  %1509 = vmatprep.subr.mxu0 %v365_v36 }
  0x77   :  { %1468 = vmatprep.mubr.f32.mxu0 %v156_v37  ;;  %1510 = vmatpush3.msra.mxu0 %v365_v36 }
  0x78   :  { %1506 = vmatprep.mubr.f32.mxu1 %v136_v38  ;;  %1511 = vmatprep.subr.mxu0 %v364_v39 }
  0x79   :  { %1512 = vmatpush3.msra.mxu0 %v364_v39  ;;  %1547 = vmatprep.subr.mxu1 %v1996_v60 }
  0x7a   :  { %1507 = vmatmul.mubr.f32.gmra.mxu1 %v137_v40  ;;  %1513 = vmatprep.subr.mxu0 %v363_v41 }
  0x7b   :  { %1469 = vmatmul.mubr.f32.gmra.mxu0 %v157_v42  ;;  %1548 = vmatpush3.msra.mxu1 %v479_v61  ;;  %v701_v42 = vld [vmem:[#allocation12 + $0xf8] sm:$0xff] }
  0x7c   :  { %1514 = vmatpush3.msra.mxu0 %v363_v41  ;;  %1541 = vmatprep.mubr.f32.mxu0 %v345_v43  ;;  %v551_v43 = vlaneseq }
  0x7d   :  { %1515 = vmatprep.subr.mxu0 %v362_v44  ;;  %1549 = vmatprep.subr.mxu1 %v1996_v60 }
  0x7e   :  { %1516 = vmatpush3.msra.mxu0 %v362_v44  ;;  %1550 = vmatpush3.msra.mxu1 %v478_v62  ;;  %v552_v44 = vshrl.u32 %v551_v43, 7 }
  0x7f   :  { %1517 = vmatprep.subr.mxu0 %v361_v45  ;;  %1551 = vmatprep.subr.mxu1 %v1996_v60 }
  0x80   :  { %1518 = vmatpush3.msra.mxu0 %v361_v45  ;;  %1552 = vmatpush3.msra.mxu1 %v477_v63  ;;  %v2141_v45 = vsub.s32 0, %v552_v44  ;;  %v1243_v44 = vld [vmem:[%s2227_s6] ss:$0 sm:$0xff] }
  0x81   :  { %1519 = vmatprep.subr.mxu0 %v360_v46  ;;  %1553 = vmatprep.subr.mxu1 %v1996_v60 }
  0x82   :  { %1520 = vmatpush3.msra.mxu0 %v360_v46  ;;  %1554 = vmatpush3.msra.mxu1 %v476_v0 }
  0x83   :  { %1521 = vmatprep.subr.mxu0 %v359_v47  ;;  %1555 = vmatprep.subr.mxu1 %v1996_v60 }
  0x84   :  { %1522 = vmatpush3.msra.mxu0 %v359_v47  ;;  %1556 = vmatpush3.msra.mxu1 %v475_v1 }
  0x85   :  { %1523 = vmatprep.subr.mxu0 %v358_v48  ;;  %1557 = vmatprep.subr.mxu1 %v1996_v60 }
  0x86   :  { %1524 = vmatpush3.msra.mxu0 %v358_v48  ;;  %1558 = vmatpush3.msra.mxu1 %v474_v2 }
  0x87   :  { %1525 = vmatprep.subr.mxu0 %v357_v49  ;;  %1559 = vmatprep.subr.mxu1 %v1996_v60 }
  0x88   :  { %1526 = vmatpush3.msra.mxu0 %v357_v49  ;;  %1560 = vmatpush3.msra.mxu1 %v473_v3 }
  0x89   :  { %1527 = vmatprep.subr.mxu0 %v356_v50  ;;  %1561 = vmatprep.subr.mxu1 %v1996_v60 }
  0x8a   :  { %1528 = vmatpush3.msra.mxu0 %v356_v50  ;;  %1562 = vmatpush3.msra.mxu1 %v472_v4 }
  0x8b   :  { %1529 = vmatprep.subr.mxu0 %v355_v51  ;;  %1563 = vmatprep.subr.mxu1 %v1996_v60 }
  0x8c   :  { %1530 = vmatpush3.msra.mxu0 %v355_v51  ;;  %1564 = vmatpush3.msra.mxu1 %v471_v5 }
  0x8d   :  { %1531 = vmatprep.subr.mxu0 %v354_v52  ;;  %1565 = vmatprep.subr.mxu1 %v1996_v60 }
  0x8e   :  { %1532 = vmatpush3.msra.mxu0 %v354_v52  ;;  %1566 = vmatpush3.msra.mxu1 %v470_v6 }
  0x8f   :  { %1533 = vmatprep.subr.mxu0 %v353_v53  ;;  %1567 = vmatprep.subr.mxu1 %v1996_v60 }
  0x90   :  { %1534 = vmatpush3.msra.mxu0 %v353_v53  ;;  %1568 = vmatpush3.msra.mxu1 %v469_v7 }
  0x91   :  { %1535 = vmatprep.subr.mxu0 %v352_v54  ;;  %1569 = vmatprep.subr.mxu1 %v1996_v60 }
  0x92   :  { %1536 = vmatpush3.msra.mxu0 %v352_v54  ;;  %1570 = vmatpush3.msra.mxu1 %v468_v8 }
  0x93   :  { %1537 = vmatprep.subr.mxu0 %v351_v55  ;;  %1571 = vmatprep.subr.mxu1 %v1996_v60 }
  0x94   :  { %1538 = vmatpush3.msra.mxu0 %v351_v55  ;;  %1572 = vmatpush3.msra.mxu1 %v467_v9 }
  0x95   :  { %1539 = vmatprep.subr.mxu0 %v350_v56  ;;  %1573 = vmatprep.subr.mxu1 %v1996_v60 }
  0x96   :  { %1540 = vmatpush3.msra.mxu0 %v350_v56  ;;  %1574 = vmatpush3.msra.mxu1 %v466_v10 }
  0x97   :  { %1542 = vmatmul.mubr.f32.vlgmr.msra.gmra.mxu0 %v346_v57  ;;  %1582 = vmatprep.subr.mxu0 %v1996_v60 }
  0x98   :  { %1544 = vmatprep.mubr.f32.mxu0 %v347_v58  ;;  %1583 = vmatpush3.msra.mxu0 %v479_v61 }
  0x99   :  { %1584 = vmatprep.subr.mxu0 %v1996_v60  ;;  %1575 = vmatprep.subr.mxu1 %v1996_v60 }
  0x9a   :  { %1585 = vmatpush3.msra.mxu0 %v478_v62  ;;  %1576 = vmatpush3.msra.mxu1 %v465_v11 }
  0x9b   :  { %1545 = vmatmul.mubr.f32.gmra.mxu0 %v348_v59  ;;  %1586 = vmatprep.subr.mxu0 %v1996_v60 }
  0x9c   :  { %1587 = vmatpush3.msra.mxu0 %v477_v63  ;;  %1577 = vmatprep.subr.mxu1 %v1996_v60 }
  0x9d   :  { %1588 = vmatprep.subr.mxu0 %v1996_v60  ;;  %1578 = vmatpush3.msra.mxu1 %v464_v12 }
  0x9e   :  { %1589 = vmatpush3.msra.mxu0 %v476_v0  ;;  %1579 = vmatprep.mubr.msk.f32.mxu1 %vm1997_vm0, %v1996_v60 }
  0x9f   :  { %1590 = vmatprep.subr.mxu0 %v1996_v60  ;;  %1614 = vmatprep.mubr.msk.f32.mxu0 %vm1997_vm0, %v1996_v60 }
  0xa0   :  { %1591 = vmatpush3.msra.mxu0 %v475_v1 }
  0xa1   :  { %1592 = vmatprep.subr.mxu0 %v1996_v60 }
  0xa2   :  { %1593 = vmatpush3.msra.mxu0 %v474_v2 }
  0xa3   :  { %1594 = vmatprep.subr.mxu0 %v1996_v60 }
  0xa4   :  { %1595 = vmatpush3.msra.mxu0 %v473_v3 }
  0xa5   :  { %1596 = vmatprep.subr.mxu0 %v1996_v60 }
  0xa6   :  { %1597 = vmatpush3.msra.mxu0 %v472_v4  ;;  %v700_v4 = vld [vmem:[#allocation12 + $0xf0] sm:$0xff] }
  0xa7   :  { %1598 = vmatprep.subr.mxu0 %v1996_v60 }
  0xa8   :  { %1599 = vmatpush3.msra.mxu0 %v471_v5  ;;  %v699_v5 = vld [vmem:[#allocation12 + $0xe8] sm:$0xff] }
  0xa9   :  { %1600 = vmatprep.subr.mxu0 %v1996_v60 }
  0xaa   :  { %1601 = vmatpush3.msra.mxu0 %v470_v6  ;;  %v698_v6 = vld [vmem:[#allocation12 + $0xe0] sm:$0xff] }
  0xab   :  { %1602 = vmatprep.subr.mxu0 %v1996_v60 }
  0xac   :  { %1603 = vmatpush3.msra.mxu0 %v469_v7  ;;  %v721_v7 = vld [vmem:[#allocation12 + $0x78] sm:$0xff] }
  0xad   :  { %1604 = vmatprep.subr.mxu0 %v1996_v60  ;;  %1617 = vmatprep.subr.mxu1 %v721_v7 }
  0xae   :  { %1605 = vmatpush3.msra.mxu0 %v468_v8  ;;  %v697_v8 = vld [vmem:[#allocation12 + $0xd8] sm:$0xff] }
  0xaf   :  { %1606 = vmatprep.subr.mxu0 %v1996_v60 }
  0xb0   :  { %1607 = vmatpush3.msra.mxu0 %v467_v9  ;;  %v720_v9 = vld [vmem:[#allocation12 + $0x70] sm:$0xff] }
  0xb1   :  { %1608 = vmatprep.subr.mxu0 %v1996_v60 }
  0xb2   :  { %1609 = vmatpush3.msra.mxu0 %v466_v10  ;;  %v696_v10 = vld [vmem:[#allocation12 + $0xd0] sm:$0xff] }
  0xb3   :  { %1610 = vmatprep.subr.mxu0 %v1996_v60 }
  0xb4   :  { %1611 = vmatpush3.msra.mxu0 %v465_v11  ;;  %v719_v11 = vld [vmem:[#allocation12 + $0x68] sm:$0xff] }
  0xb5   :  { %1612 = vmatprep.subr.mxu0 %v1996_v60 }
  0xb6   :  { %1613 = vmatpush3.msra.mxu0 %v464_v12  ;;  %v695_v12 = vld [vmem:[#allocation12 + $0xc8] sm:$0xff] }
  0xb7   :  { %1655 = vmatprep.subr.mxu0 %v701_v42 }
 0x135   :  { %v1467_v13 = vpop.f32.mrf.mxu0 }
 0x136   :  { %v1505_v14 = vpop.f32.mrf.mxu1 }
 0x137   :  { %v241_v15 = vpop.f32.mrf.mxu0  ;;  %v332_v24 = vadd.f32 %v1505_v14, %v1467_v13  ;;  %v718_v13 = vld [vmem:[#allocation12 + $0x60] sm:$0xff] }
 0x138   :  { %v326_v17 = vpop.f32.mrf.mxu1  ;;  %v694_v14 = vld [vmem:[#allocation12 + $0xc0] sm:$0xff] }
 0x139   :  { %v327_v21 = vadd.f32 %v326_v17, %v241_v15  ;;  %v717_v15 = vld [vmem:[#allocation12 + $0x58] sm:$0xff]  ;;  %v716_v17 = vld [vmem:[#allocation12 + $0x50] sm:$0xff] }
 0x13a   :  { %v1508_v18 = vpop.f32.mrf.mxu1 }
 0x13b   :  { %v1470_v16 = vpop.f32.mrf.mxu0 }
 0x13c   :  { %v336_v22 = vpop.f32.mrf.mxu1  ;;  %v342_v30 = vadd.f32 %v1508_v18, %v1470_v16  ;;  %v693_v16 = vld [vmem:[#allocation12 + $0xb8] sm:$0xff]  ;;  %v692_v18 = vld [vmem:[#allocation12 + $0xb0] sm:$0xff] }
 0x13d   :  { %v251_v19 = vpop.f32.mrf.mxu0 }
 0x13e   :  { %v337_v27 = vadd.f32 %v336_v22, %v251_v19  ;;  %v715_v19 = vld [vmem:[#allocation12 + $0x48] sm:$0xff]  ;;  %v690_v22 = vld [vmem:[#allocation12 + $0xa0] sm:$0xff] }
 0x157   :  { %v1543_v20 = vpop.f32.mrf.mxu0 }
 0x158   :  { %v452_v28 = vadd.f32 %v1543_v20, %v332_v24  ;;  %v691_v20 = vld [vmem:[#allocation12 + $0xa8] sm:$0xff]  ;;  %v689_v24 = vld [vmem:[#allocation12 + $0x98] sm:$0xff] }
 0x159   :  { %v432_v23 = vpop.f32.mrf.mxu0 }
 0x15a   :  { %v451_v25 = vadd.f32 %v432_v23, %v327_v21  ;;  %v714_v21 = vld [vmem:[#allocation12 + $0x40] sm:$0xff]  ;;  %v713_v23 = vld [vmem:[#allocation12 + $0x38] sm:$0xff] }
 0x15b   :  { %v1546_v26 = vpop.f32.mrf.mxu0 }
 0x15c   :  { %v455_v31 = vadd.f32 %v452_v28, %v451_v25  ;;  %v454_v33 = vadd.f32 %v1546_v26, %v342_v30  ;;  %v688_v26 = vld [vmem:[#allocation12 + $0x90] sm:$0xff]  ;;  %v686_v30 = vld [vmem:[#allocation12 + $0x80] sm:$0xff] }
 0x15d   :  { %v442_v29 = vpop.f32.mrf.mxu0 }
 0x15e   :  { %v453_v32 = vadd.f32 %v442_v29, %v337_v27  ;;  %v711_v27 = vld [vmem:[#allocation12 + $0x28] sm:$0xff]  ;;  %v710_v29 = vld [vmem:[#allocation12 + $0x20] sm:$0xff] }
 0x160   :  { %v456_v34 = vadd.f32 %v455_v31, %v453_v32  ;;  %v709_v31 = vld [vmem:[#allocation12 + $0x18] sm:$0xff] }
 0x162   :  { %v457_v35 = vadd.f32 %v456_v34, %v454_v33  ;;  %v706_v34 = vld [vmem:[#allocation12] sm:$0xff] }
 0x164   :  { %v458_v36 = vrot.slane %v457_v35, 4 }
 0x166   :  { %v459_v37 = vadd.f32 %v458_v36, %v457_v35  ;;  %v912_v35 = vld [vmem:[#allocation12 + $0x178] sm:$0xff] }
 0x168   :  { %v460_v38 = vrot.slane %v459_v37, 2 }
 0x16a   :  { %v461_v39 = vadd.f32 %v460_v38, %v459_v37 }
 0x16c   :  { %v462_v40 = vrot.slane %v461_v39, 1 }
 0x16e   :  { %v463_v41 = vadd.f32 %v462_v40, %v461_v39  ;;  %v643_v40 = vld [vmem:[%s2226_s5] sm:$0x1] }
 0x170   :  { %1580 = vmatmul.mubr.f32.vlgmr.msra.gmra.mxu1 %v463_v41 }
 0x171   :  { %1618 = vmatpush3.msra.mxu1 %v721_v7  ;;  %v904_v7 = vld [vmem:[#allocation12 + $0x138] sm:$0xff] }
 0x172   :  { %1619 = vmatprep.subr.mxu1 %v720_v9 }
 0x173   :  { %1620 = vmatpush3.msra.mxu1 %v720_v9  ;;  %v902_v9 = vld [vmem:[#allocation12 + $0x128] sm:$0xff] }
 0x174   :  { %1621 = vmatprep.subr.mxu1 %v719_v11 }
 0x175   :  { %1622 = vmatpush3.msra.mxu1 %v719_v11  ;;  %v900_v11 = vld [vmem:[#allocation12 + $0x118] sm:$0xff] }
 0x176   :  { %1623 = vmatprep.subr.mxu1 %v718_v13 }
 0x177   :  { %1624 = vmatpush3.msra.mxu1 %v718_v13  ;;  %v898_v13 = vld [vmem:[#allocation12 + $0x108] sm:$0xff] }
 0x178   :  { %1625 = vmatprep.subr.mxu1 %v717_v15 }
 0x179   :  { %1626 = vmatpush3.msra.mxu1 %v717_v15 }
 0x17a   :  { %1627 = vmatprep.subr.mxu1 %v716_v17 }
 0x17b   :  { %1628 = vmatpush3.msra.mxu1 %v716_v17 }
 0x17c   :  { %1629 = vmatprep.subr.mxu1 %v715_v19 }
 0x17d   :  { %1630 = vmatpush3.msra.mxu1 %v715_v19  ;;  %v1025_v19 = vld [vmem:[#allocation14 + $0x70] sm:$0xff] }
 0x17e   :  { %1631 = vmatprep.subr.mxu1 %v714_v21 }
 0x17f   :  { %1632 = vmatpush3.msra.mxu1 %v714_v21  ;;  %v1023_v21 = vld [vmem:[#allocation14 + $0x60] sm:$0xff] }
 0x180   :  { %1633 = vmatprep.subr.mxu1 %v713_v23 }
 0x181   :  { %1634 = vmatpush3.msra.mxu1 %v713_v23  ;;  %v1021_v23 = vld [vmem:[#allocation14 + $0x50] sm:$0xff] }
 0x230   :  { %v546_v46 = vpop.f32.mrf.mxu1 }
 0x231   :  { %v550_v47 = vmul.f32 0.001953125, %v546_v46 }
 0x232   :  { %v1581_v48 = vpop.f32.mrf.mxu1 }
 0x233   :  { %v554_v49 = vrot.slane %v550_v47, %v2141_v45 }
 0x235   :  { %v2144_v50 = vsub.f32 %v451_v25, %v554_v49  ;;  %v2146_v51 = vsub.f32 %v452_v28, %v554_v49  ;;  %v2148_v52 = vsub.f32 %v453_v32, %v554_v49  ;;  %v2150_v53 = vsub.f32 %v454_v33, %v554_v49  ;;  %v712_v25 = vld [vmem:[#allocation12 + $0x30] sm:$0xff]  ;;  %v687_v28 = vld [vmem:[#allocation12 + $0x88] sm:$0xff] }
 0x236   :  { %1635 = vmatprep.subr.mxu1 %v712_v25  ;;  %v708_v32 = vld [vmem:[#allocation12 + $0x10] sm:$0xff]  ;;  %v707_v33 = vld [vmem:[#allocation12 + $0x8] sm:$0xff] }
 0x237   :  { %v559_v54 = vmul.f32 %v2144_v50, %v2144_v50  ;;  %v560_v55 = vmul.f32 %v2146_v51, %v2146_v51  ;;  %v561_v56 = vmul.f32 %v2148_v52, %v2148_v52  ;;  %v562_v58 = vmul.f32 %v2150_v53, %v2150_v53  ;;  %1636 = vmatpush3.msra.mxu1 %v712_v25  ;;  %v1019_v25 = vld [vmem:[#allocation14 + $0x40] sm:$0xff] }
 0x238   :  { %1637 = vmatprep.subr.mxu1 %v711_v27 }
 0x239   :  { %v563_v57 = vadd.f32 %v560_v55, %v559_v54  ;;  %1638 = vmatpush3.msra.mxu1 %v711_v27  ;;  %v1017_v27 = vld [vmem:[#allocation14 + $0x30] sm:$0xff] }
 0x23a   :  { %1639 = vmatprep.subr.mxu1 %v710_v29 }
 0x23b   :  { %v564_v59 = vadd.f32 %v563_v57, %v561_v56  ;;  %1640 = vmatpush3.msra.mxu1 %v710_v29  ;;  %v1015_v29 = vld [vmem:[#allocation14 + $0x20] sm:$0xff] }
 0x23c   :  { %1641 = vmatprep.subr.mxu1 %v709_v31 }
 0x23d   :  { %v565_v61 = vadd.f32 %v564_v59, %v562_v58  ;;  %1642 = vmatpush3.msra.mxu1 %v709_v31  ;;  %v1013_v31 = vld [vmem:[#allocation14 + $0x10] sm:$0xff] }
 0x23e   :  { %1643 = vmatprep.subr.mxu1 %v708_v32 }
 0x23f   :  { %v566_v62 = vrot.slane %v565_v61, 4  ;;  %1644 = vmatpush3.msra.mxu1 %v708_v32  ;;  %v1012_v32 = vld [vmem:[#allocation14 + $0x8] sm:$0xff] }
 0x240   :  { %1645 = vmatprep.subr.mxu1 %v707_v33 }
 0x241   :  { %v567_v63 = vadd.f32 %v566_v62, %v565_v61  ;;  %1646 = vmatpush3.msra.mxu1 %v707_v33  ;;  %v1011_v33 = vld [vmem:[#allocation14] sm:$0xff] }
 0x242   :  { %1647 = vmatprep.subr.mxu1 %v706_v34 }
 0x243   :  { %v568_v0 = vrot.slane %v567_v63, 2  ;;  %1648 = vmatpush3.msra.mxu1 %v706_v34 }
 0x244   :  { %1693 = vmatprep.subr.mxu1 %v912_v35 }
 0x245   :  { %v569_v1 = vadd.f32 %v568_v0, %v567_v63  ;;  %v910_v63 = vld [vmem:[#allocation12 + $0x168] sm:$0xff] }
 0x247   :  { %v570_v2 = vrot.slane %v569_v1, 1 }
 0x249   :  { %v571_v3 = vadd.f32 %v570_v2, %v569_v1  ;;  %v909_v1 = vld [vmem:[#allocation12 + $0x160] sm:$0xff] }
 0x24b   :  { %1615 = vmatmul.mubr.f32.vlgmr.msra.gmra.mxu0 %v571_v3  ;;  %v908_v3 = vld [vmem:[#allocation12 + $0x158] sm:$0xff] }
 0x24c   :  { %1656 = vmatpush3.msra.mxu0 %v701_v42 }
 0x24d   :  { %1657 = vmatprep.subr.mxu0 %v700_v4 }
 0x24e   :  { %1658 = vmatpush3.msra.mxu0 %v700_v4  ;;  %v907_v4 = vld [vmem:[#allocation12 + $0x150] sm:$0xff] }
 0x24f   :  { %1659 = vmatprep.subr.mxu0 %v699_v5 }
 0x250   :  { %1660 = vmatpush3.msra.mxu0 %v699_v5  ;;  %v906_v5 = vld [vmem:[#allocation12 + $0x148] sm:$0xff] }
 0x251   :  { %1661 = vmatprep.subr.mxu0 %v698_v6 }
 0x252   :  { %1662 = vmatpush3.msra.mxu0 %v698_v6  ;;  %v905_v6 = vld [vmem:[#allocation12 + $0x140] sm:$0xff] }
 0x253   :  { %1663 = vmatprep.subr.mxu0 %v697_v8 }
 0x254   :  { %1664 = vmatpush3.msra.mxu0 %v697_v8  ;;  %v903_v8 = vld [vmem:[#allocation12 + $0x130] sm:$0xff] }
 0x255   :  { %1665 = vmatprep.subr.mxu0 %v696_v10 }
 0x256   :  { %1666 = vmatpush3.msra.mxu0 %v696_v10  ;;  %v901_v10 = vld [vmem:[#allocation12 + $0x120] sm:$0xff] }
 0x257   :  { %1667 = vmatprep.subr.mxu0 %v695_v12 }
 0x258   :  { %1668 = vmatpush3.msra.mxu0 %v695_v12  ;;  %v899_v12 = vld [vmem:[#allocation12 + $0x110] sm:$0xff] }
 0x259   :  { %1669 = vmatprep.subr.mxu0 %v694_v14 }
 0x25a   :  { %1670 = vmatpush3.msra.mxu0 %v694_v14  ;;  %v897_v14 = vld [vmem:[#allocation12 + $0x100] sm:$0xff] }
 0x25b   :  { %1671 = vmatprep.subr.mxu0 %v693_v16 }
 0x25c   :  { %1672 = vmatpush3.msra.mxu0 %v693_v16 }
 0x25d   :  { %1673 = vmatprep.subr.mxu0 %v692_v18 }
 0x25e   :  { %1674 = vmatpush3.msra.mxu0 %v692_v18  ;;  %v1026_v18 = vld [vmem:[#allocation14 + $0x78] sm:$0xff] }
 0x25f   :  { %1675 = vmatprep.subr.mxu0 %v691_v20 }
 0x260   :  { %1676 = vmatpush3.msra.mxu0 %v691_v20  ;;  %v1024_v20 = vld [vmem:[#allocation14 + $0x68] sm:$0xff] }
 0x261   :  { %1677 = vmatprep.subr.mxu0 %v690_v22 }
 0x262   :  { %1678 = vmatpush3.msra.mxu0 %v690_v22  ;;  %v1022_v22 = vld [vmem:[#allocation14 + $0x58] sm:$0xff] }
 0x263   :  { %1679 = vmatprep.subr.mxu0 %v689_v24 }
 0x264   :  { %1680 = vmatpush3.msra.mxu0 %v689_v24  ;;  %v1020_v24 = vld [vmem:[#allocation14 + $0x48] sm:$0xff] }
 0x265   :  { %1681 = vmatprep.subr.mxu0 %v688_v26 }
 0x266   :  { %1682 = vmatpush3.msra.mxu0 %v688_v26  ;;  %v1018_v26 = vld [vmem:[#allocation14 + $0x38] sm:$0xff] }
 0x267   :  { %1683 = vmatprep.subr.mxu0 %v687_v28 }
 0x268   :  { %1684 = vmatpush3.msra.mxu0 %v687_v28  ;;  %v1016_v28 = vld [vmem:[#allocation14 + $0x28] sm:$0xff] }
 0x269   :  { %1685 = vmatprep.subr.mxu0 %v686_v30 }
 0x26a   :  { %1686 = vmatpush3.msra.mxu0 %v686_v30  ;;  %v1014_v30 = vld [vmem:[#allocation14 + $0x18] sm:$0xff] }
 0x26b   :  { %1731 = vmatprep.subr.mxu0 %v1996_v60 }
 0x30b   :  { %v638_v36 = vpop.f32.mrf.mxu0 }
 0x30c   :  { %v642_v37 = vmul.f32 0.001953125, %v638_v36 }
 0x30d   :  { %v1616_v38 = vpop.f32.mrf.mxu0 }
 0x30e   :  { %v644_v39 = vadd.f32 1e-05, %v642_v37 }
 0x310   :  { %1813 = vrsqrt.f32 %v644_v39 }
 0x31d   :  { %v1814_v41 = vpop.eup %1813 }
 0x31e   :  { %v646_v42 = vmul.f32 %v1814_v41, %v643_v40 }
 0x320   :  { %v651_v43 = vrot.slane %v646_v42, %v2141_v45 }
 0x322   :  { %v653_v46 = vmul.f32 %v651_v43, %v2144_v50  ;;  %v654_v47 = vmul.f32 %v651_v43, %v2146_v51  ;;  %v655_v48 = vmul.f32 %v651_v43, %v2148_v52  ;;  %v656_v49 = vmul.f32 %v651_v43, %v2150_v53  ;;  %v911_v52 = vld [vmem:[#allocation12 + $0x170] sm:$0xff] }
 0x324   :  { %v664_v54 = vadd.f32 %v1243_v44, %v653_v46  ;;  %v665_v55 = vadd.f32 %v1243_v44, %v654_v47  ;;  %v666_v56 = vadd.f32 %v1243_v44, %v655_v48  ;;  %v667_v57 = vadd.f32 %v1243_v44, %v656_v49 }
 0x326   :  { %v668_v58 = vmax.f32 %v664_v54, 0.0  ;;  %v669_v59 = vmax.f32 %v665_v55, 0.0  ;;  %v670_v61 = vmax.f32 %v666_v56, 0.0  ;;  %v671_v62 = vmax.f32 %v667_v57, 0.0 }
 0x328   :  { %673 = vst [vmem:[#allocation2 + $0x1] sm:$0xff] %v668_v58  ;;  %676 = vst [vmem:[#allocation2 + $0x1f] sm:$0xfe] %v668_v58  ;;  %1687 = vmatprep.mubr.f32.mxu0 %v668_v58 }
 0x329   :  { %674 = vst [vmem:[#allocation2 + $0x9] sm:$0x7f] %v669_v59  ;;  %677 = vst [vmem:[#allocation2 + $0x27] sm:$0xff] %v669_v59  ;;  %1688 = vmatmul.mubr.f32.vlgmr.msra.gmra.mxu0 %v669_v59 }
 0x32a   :  { %680 = vst [vmem:[#allocation2 + $0x11] sm:$0xff] %v670_v61  ;;  %682 = vst [vmem:[#allocation2 + $0x2f] sm:$0xfe] %v670_v61  ;;  %1690 = vmatprep.mubr.f32.mxu0 %v670_v61  ;;  %1732 = vmatpush3.msra.mxu0 %v1026_v18 }
 0x32b   :  { %681 = vst [vmem:[#allocation2 + $0x19] sm:$0x7f] %v671_v62  ;;  %683 = vst [vmem:[#allocation2 + $0x37] sm:$0xff] %v671_v62  ;;  %1733 = vmatprep.subr.mxu0 %v1996_v60 }
 0x32c   :  { %1734 = vmatpush3.msra.mxu0 %v1025_v19 }
 0x32d   :  { %1691 = vmatmul.mubr.f32.gmra.mxu0 %v671_v62  ;;  %1735 = vmatprep.subr.mxu0 %v1996_v60 }
 0x32e   :  { %1763 = vmatprep.mubr.msk.f32.mxu0 %vm1997_vm0, %v1996_v60  ;;  %1736 = vmatpush3.msra.mxu0 %v1024_v20 }
 0x32f   :  { %v702_v50 = vld [vmem:[#allocation2] sm:$0xff]  ;;  %1737 = vmatprep.subr.mxu0 %v1996_v60 }
 0x330   :  { %v703_v51 = vld [vmem:[#allocation2 + $0x8] sm:$0xff]  ;;  %1649 = vmatprep.mubr.f32.mxu1 %v702_v50  ;;  %v892_v2 = vld [vmem:[#allocation2 + $0x20] sm:$0xff]  ;;  %1738 = vmatpush3.msra.mxu0 %v1023_v21 }
 0x331   :  { %1650 = vmatmul.mubr.f32.vlgmr.msra.gmra.mxu1 %v703_v51  ;;  %v704_v53 = vld [vmem:[#allocation2 + $0x10] sm:$0xff]  ;;  %v893_v15 = vld [vmem:[#allocation2 + $0x28] sm:$0xff]  ;;  %1739 = vmatprep.subr.mxu0 %v1996_v60 }
 0x332   :  { %1694 = vmatpush3.msra.mxu1 %v912_v35  ;;  %1652 = vmatprep.mubr.f32.mxu1 %v704_v53  ;;  %v705_v0 = vld [vmem:[#allocation2 + $0x18] sm:$0xff]  ;;  %v894_v16 = vld [vmem:[#allocation2 + $0x30] sm:$0xff] }
 0x333   :  { %1695 = vmatprep.subr.mxu1 %v911_v52  ;;  %v895_v17 = vld [vmem:[#allocation2 + $0x38] sm:$0xff]  ;;  %1740 = vmatpush3.msra.mxu0 %v1022_v22 }
 0x334   :  { %1696 = vmatpush3.msra.mxu1 %v911_v52  ;;  %1741 = vmatprep.subr.mxu0 %v1996_v60 }
 0x335   :  { %1697 = vmatprep.subr.mxu1 %v910_v63  ;;  %1653 = vmatmul.mubr.f32.gmra.mxu1 %v705_v0 }
 0x336   :  { %1698 = vmatpush3.msra.mxu1 %v910_v63  ;;  %1725 = vmatprep.mubr.f32.mxu1 %v892_v2 }
 0x337   :  { %1699 = vmatprep.subr.mxu1 %v909_v1  ;;  %1742 = vmatpush3.msra.mxu0 %v1021_v23 }
 0x338   :  { %1700 = vmatpush3.msra.mxu1 %v909_v1  ;;  %1743 = vmatprep.subr.mxu0 %v1996_v60 }
 0x339   :  { %1701 = vmatprep.subr.mxu1 %v908_v3  ;;  %1744 = vmatpush3.msra.mxu0 %v1020_v24 }
 0x33a   :  { %1702 = vmatpush3.msra.mxu1 %v908_v3  ;;  %1745 = vmatprep.subr.mxu0 %v1996_v60 }
 0x33b   :  { %1703 = vmatprep.subr.mxu1 %v907_v4  ;;  %1746 = vmatpush3.msra.mxu0 %v1019_v25 }
 0x33c   :  { %1704 = vmatpush3.msra.mxu1 %v907_v4  ;;  %1747 = vmatprep.subr.mxu0 %v1996_v60 }
 0x33d   :  { %1705 = vmatprep.subr.mxu1 %v906_v5  ;;  %1748 = vmatpush3.msra.mxu0 %v1018_v26 }
 0x33e   :  { %1706 = vmatpush3.msra.mxu1 %v906_v5  ;;  %1749 = vmatprep.subr.mxu0 %v1996_v60 }
 0x33f   :  { %1707 = vmatprep.subr.mxu1 %v905_v6  ;;  %1750 = vmatpush3.msra.mxu0 %v1017_v27 }
 0x340   :  { %1708 = vmatpush3.msra.mxu1 %v905_v6  ;;  %1751 = vmatprep.subr.mxu0 %v1996_v60 }
 0x341   :  { %1709 = vmatprep.subr.mxu1 %v904_v7  ;;  %1752 = vmatpush3.msra.mxu0 %v1016_v28 }
 0x342   :  { %1710 = vmatpush3.msra.mxu1 %v904_v7  ;;  %1753 = vmatprep.subr.mxu0 %v1996_v60 }
 0x343   :  { %1711 = vmatprep.subr.mxu1 %v903_v8  ;;  %1754 = vmatpush3.msra.mxu0 %v1015_v29 }
 0x344   :  { %1712 = vmatpush3.msra.mxu1 %v903_v8  ;;  %1755 = vmatprep.subr.mxu0 %v1996_v60 }
 0x345   :  { %1713 = vmatprep.subr.mxu1 %v902_v9  ;;  %1756 = vmatpush3.msra.mxu0 %v1014_v30 }
 0x346   :  { %1714 = vmatpush3.msra.mxu1 %v902_v9  ;;  %1757 = vmatprep.subr.mxu0 %v1996_v60 }
 0x347   :  { %1715 = vmatprep.subr.mxu1 %v901_v10  ;;  %1758 = vmatpush3.msra.mxu0 %v1013_v31 }
 0x348   :  { %1716 = vmatpush3.msra.mxu1 %v901_v10  ;;  %1759 = vmatprep.subr.mxu0 %v1996_v60 }
 0x349   :  { %1717 = vmatprep.subr.mxu1 %v900_v11  ;;  %1760 = vmatpush3.msra.mxu0 %v1012_v32 }
 0x34a   :  { %1718 = vmatpush3.msra.mxu1 %v900_v11  ;;  %1761 = vmatprep.subr.mxu0 %v1996_v60 }
 0x34b   :  { %1719 = vmatprep.subr.mxu1 %v899_v12  ;;  %1762 = vmatpush3.msra.mxu0 %v1011_v33 }
 0x34c   :  { %1720 = vmatpush3.msra.mxu1 %v899_v12 }
 0x34d   :  { %1721 = vmatprep.subr.mxu1 %v898_v13 }
 0x34e   :  { %1722 = vmatpush3.msra.mxu1 %v898_v13 }
 0x34f   :  { %1723 = vmatprep.subr.mxu1 %v897_v14 }
 0x350   :  { %1724 = vmatpush3.msra.mxu1 %v897_v14 }
 0x351   :  { %1726 = vmatmul.mubr.f32.vlgmr.msra.gmra.mxu1 %v893_v15  ;;  %1766 = vmatprep.subr.mxu1 %v1996_v60 }
 0x352   :  { %1728 = vmatprep.mubr.f32.mxu1 %v894_v16  ;;  %1767 = vmatpush3.msra.mxu1 %v1026_v18 }
 0x353   :  { %1768 = vmatprep.subr.mxu1 %v1996_v60 }
 0x354   :  { %1769 = vmatpush3.msra.mxu1 %v1025_v19 }
 0x355   :  { %1729 = vmatmul.mubr.f32.gmra.mxu1 %v895_v17  ;;  %1770 = vmatprep.subr.mxu1 %v1996_v60 }
 0x356   :  { %1798 = vmatprep.mubr.msk.f32.mxu1 %vm1997_vm0, %v1996_v60  ;;  %1771 = vmatpush3.msra.mxu1 %v1024_v20 }
 0x357   :  { %1772 = vmatprep.subr.mxu1 %v1996_v60 }
 0x358   :  { %1773 = vmatpush3.msra.mxu1 %v1023_v21 }
 0x359   :  { %1774 = vmatprep.subr.mxu1 %v1996_v60 }
 0x35a   :  { %1775 = vmatpush3.msra.mxu1 %v1022_v22 }
 0x35b   :  { %1776 = vmatprep.subr.mxu1 %v1996_v60 }
 0x35c   :  { %1777 = vmatpush3.msra.mxu1 %v1021_v23 }
 0x35d   :  { %1778 = vmatprep.subr.mxu1 %v1996_v60 }
 0x35e   :  { %1779 = vmatpush3.msra.mxu1 %v1020_v24 }
 0x35f   :  { %1780 = vmatprep.subr.mxu1 %v1996_v60 }
 0x360   :  { %1781 = vmatpush3.msra.mxu1 %v1019_v25  ;;  %v1190_v25 = vld [vmem:[%s2230_s9] sm:$0x1]  ;;  %s1957_s9 = scalar_lea.vmem %s1229_s16, 512 }
 0x361   :  { %1782 = vmatprep.subr.mxu1 %v1996_v60  ;;  %p1958_p7 = scmp.ne.s32.totalorder %s1229_s16, %s1957_s9  ;;  %p1963_p9 = scmp.lt.s32.totalorder %s1957_s9, %s1957_s9 }
 0x362   :  { %1783 = vmatpush3.msra.mxu1 %v1018_v26 }
 0x363   :  { %1784 = vmatprep.subr.mxu1 %v1996_v60  ;;  %p1964_p10 = por %p1963_p9, %p1962_p8 }
 0x364   :  { %1785 = vmatpush3.msra.mxu1 %v1017_v27 }
 0x365   :  { %1786 = vmatprep.subr.mxu1 %v1996_v60  ;;  %p1965_p11 = pnand %p1964_p10, %p1958_p7 }
 0x366   :  { %1787 = vmatpush3.msra.mxu1 %v1016_v28 }
 0x367   :  { %1788 = vmatprep.subr.mxu1 %v1996_v60 }
 0x368   :  { %1789 = vmatpush3.msra.mxu1 %v1015_v29  ;;  %v1244_v29 = vld [vmem:[%s2231_s10] ss:$0 sm:$0xff] }
 0x369   :  { %1790 = vmatprep.subr.mxu1 %v1996_v60 }
 0x36a   :  { %1791 = vmatpush3.msra.mxu1 %v1014_v30 }
 0x36b   :  { %1792 = vmatprep.subr.mxu1 %v1996_v60 }
 0x36c   :  { %1793 = vmatpush3.msra.mxu1 %v1013_v31 }
 0x36d   :  { %1794 = vmatprep.subr.mxu1 %v1996_v60 }
 0x36e   :  { %1795 = vmatpush3.msra.mxu1 %v1012_v32 }
 0x36f   :  { %1796 = vmatprep.subr.mxu1 %v1996_v60 }
 0x370   :  { %1797 = vmatpush3.msra.mxu1 %v1011_v33 }
 0x3e9   :  { %v1689_v36 = vpop.f32.mrf.mxu0 }
 0x3eb   :  { %v873_v38 = vpop.f32.mrf.mxu0 }
 0x3ed   :  { %v1692_v40 = vpop.f32.mrf.mxu0 }
 0x3ef   :  { %v883_v47 = vpop.f32.mrf.mxu0 }
 0x3f1   :  { %v1651_v34 = vpop.f32.mrf.mxu1 }
 0x3f2   :  { %v879_v44 = vadd.f32 %v1689_v36, %v1651_v34 }
 0x3f3   :  { %v788_v35 = vpop.f32.mrf.mxu1 }
 0x3f4   :  { %v874_v42 = vadd.f32 %v873_v38, %v788_v35 }
 0x3f5   :  { %v1654_v37 = vpop.f32.mrf.mxu1 }
 0x3f6   :  { %v889_v60 = vadd.f32 %v1692_v40, %v1654_v37 }
 0x3f7   :  { %v798_v39 = vpop.f32.mrf.mxu1 }
 0x3f8   :  { %v884_v49 = vadd.f32 %v883_v47, %v798_v39 }
 0x411   :  { %v1727_v41 = vpop.f32.mrf.mxu1 }
 0x412   :  { %v999_v54 = vadd.f32 %v1727_v41, %v879_v44 }
 0x413   :  { %v979_v43 = vpop.f32.mrf.mxu1 }
 0x414   :  { %v998_v46 = vadd.f32 %v979_v43, %v874_v42 }
 0x415   :  { %v1730_v48 = vpop.f32.mrf.mxu1 }
 0x416   :  { %v1002_v56 = vadd.f32 %v999_v54, %v998_v46  ;;  %v1001_v58 = vadd.f32 %v1730_v48, %v889_v60 }
 0x417   :  { %v989_v55 = vpop.f32.mrf.mxu1 }
 0x418   :  { %v1000_v57 = vadd.f32 %v989_v55, %v884_v49 }
 0x41a   :  { %v1003_v59 = vadd.f32 %v1002_v56, %v1000_v57 }
 0x41c   :  { %v1004_v61 = vadd.f32 %v1003_v59, %v1001_v58 }
 0x41e   :  { %v1005_v62 = vrot.slane %v1004_v61, 4 }
 0x420   :  { %v1006_v50 = vadd.f32 %v1005_v62, %v1004_v61 }
 0x422   :  { %v1007_v51 = vrot.slane %v1006_v50, 2 }
 0x424   :  { %v1008_v52 = vadd.f32 %v1007_v51, %v1006_v50 }
 0x426   :  { %v1009_v53 = vrot.slane %v1008_v52, 1 }
 0x428   :  { %v1010_v63 = vadd.f32 %v1009_v53, %v1008_v52 }
 0x42a   :  { %1764 = vmatmul.mubr.f32.vlgmr.msra.gmra.mxu0 %v1010_v63 }
 0x4ea   :  { %v1093_v0 = vpop.f32.mrf.mxu0 }
 0x4eb   :  { %v1097_v1 = vmul.f32 0.001953125, %v1093_v0 }
 0x4ec   :  { %v1765_v2 = vpop.f32.mrf.mxu0 }
 0x4ed   :  { %v1101_v3 = vrot.slane %v1097_v1, %v2141_v45 }
 0x4ef   :  { %v1102_v4 = vsub.f32 %v998_v46, %v1101_v3  ;;  %v1103_v5 = vsub.f32 %v999_v54, %v1101_v3  ;;  %v1104_v6 = vsub.f32 %v1000_v57, %v1101_v3  ;;  %v1105_v7 = vsub.f32 %v1001_v58, %v1101_v3 }
 0x4f1   :  { %v1106_v8 = vmul.f32 %v1102_v4, %v1102_v4  ;;  %v1107_v9 = vmul.f32 %v1103_v5, %v1103_v5  ;;  %v1108_v10 = vmul.f32 %v1104_v6, %v1104_v6  ;;  %v1109_v12 = vmul.f32 %v1105_v7, %v1105_v7 }
 0x4f3   :  { %v1110_v11 = vadd.f32 %v1107_v9, %v1106_v8 }
 0x4f5   :  { %v1111_v13 = vadd.f32 %v1110_v11, %v1108_v10 }
 0x4f7   :  { %v1112_v14 = vadd.f32 %v1111_v13, %v1109_v12 }
 0x4f9   :  { %v1113_v15 = vrot.slane %v1112_v14, 4 }
 0x4fb   :  { %v1114_v16 = vadd.f32 %v1113_v15, %v1112_v14 }
 0x4fd   :  { %v1115_v17 = vrot.slane %v1114_v16, 2 }
 0x4ff   :  { %v1116_v18 = vadd.f32 %v1115_v17, %v1114_v16 }
 0x501   :  { %v1117_v19 = vrot.slane %v1116_v18, 1 }
 0x503   :  { %v1118_v20 = vadd.f32 %v1117_v19, %v1116_v18 }
 0x505   :  { %1799 = vmatmul.mubr.f32.vlgmr.msra.gmra.mxu1 %v1118_v20 }
 0x5c5   :  { %v1185_v21 = vpop.f32.mrf.mxu1 }
 0x5c6   :  { %v1189_v22 = vmul.f32 0.001953125, %v1185_v21 }
 0x5c7   :  { %v1800_v23 = vpop.f32.mrf.mxu1 }
 0x5c8   :  { %v1191_v24 = vadd.f32 1e-05, %v1189_v22 }
 0x5ca   :  { %1815 = vrsqrt.f32 %v1191_v24 }
 0x5d7   :  { %v1816_v26 = vpop.eup %1815 }
 0x5d8   :  { %v1193_v27 = vmul.f32 %v1816_v26, %v1190_v25 }
 0x5da   :  { %v1198_v28 = vrot.slane %v1193_v27, %v2141_v45 }
 0x5dc   :  { %v1200_v30 = vmul.f32 %v1198_v28, %v1102_v4  ;;  %v1201_v31 = vmul.f32 %v1198_v28, %v1103_v5  ;;  %v1202_v32 = vmul.f32 %v1198_v28, %v1104_v6  ;;  %v1203_v33 = vmul.f32 %v1198_v28, %v1105_v7 }
 0x5de   :  { %v1211_v34 = vadd.f32 %v1244_v29, %v1200_v30  ;;  %v1212_v35 = vadd.f32 %v1244_v29, %v1201_v31  ;;  %v1213_v36 = vadd.f32 %v1244_v29, %v1202_v32  ;;  %v1214_v37 = vadd.f32 %v1244_v29, %v1203_v33 }
 0x5e0   :  { %v1215_v38 = vmax.f32 %v1211_v34, 0.0  ;;  %v1216_v39 = vmax.f32 %v1212_v35, 0.0  ;;  %v1217_v40 = vmax.f32 %v1213_v36, 0.0  ;;  %v1218_v41 = vmax.f32 %v1214_v37, 0.0 }
 0x5e2   :  { %1219 = vst [vmem:[#allocation15] sm:$0xff] %v1215_v38  ;;  %1220 = vst [vmem:[#allocation15 + $0x8] sm:$0xff] %v1216_v39 }
 0x5e3   :  { %1221 = vst [vmem:[#allocation15 + $0x10] sm:$0xff] %v1217_v40  ;;  %1222 = vst [vmem:[#allocation15 + $0x18] sm:$0xff] %v1218_v41 }
 0x5e4   :  { %1968 = shalt.err (!%p1965_p11)
}
 0x5e5   :  { %1234 = dma.vmem_to_hbm [thread:$0]  %s1229_s16, 512, %s2232_s11, [#allocation5], %s1989_s22, %s1989_s22, %s1990_s23  }
 0x5e6   :  { %1985 = dma.done.wait [#allocation5], 512  }
 0x5e7   :  { %1986 = vsyncadd [#allocation5], 4294966784 }
 0x5e8   :  { %1238 = vsyncpa [#allocation4], 1 }
 0x5e9   :  { %1239 = vsyncpa [#allocation7], 1 }
 0x5ea   :  { %1240 = vsyncpa [#allocation10], 1 }
 0x5eb   :  { %1241 = vsyncpa [#allocation13], 1 }
 0x5ec   :  { %1242 = vsyncpa [#allocation5], 1 }

</bundles_post_ra>
